<compile_context>
chip_gen: v5e
topology: v5e:2x2
jax: 0.10.0
libtpu: 0.0.40
codegen_flags: <defaults>
</compile_context>

<pallas_src>
import functools

import jax
import jax.numpy as jnp
from jax.experimental import pallas as pl
from jax.experimental.pallas import tpu as pltpu

LN_EPS = 1e-8                      # SASRec layer-norm epsilon
MASK_VAL = -(2.0 ** 32) + 1.0      # SASRec padding fill value


def _layer_norm(v, gamma, beta):
    mu = jnp.mean(v, axis=-1, keepdims=True)
    var = jnp.mean(jnp.square(v - mu), axis=-1, keepdims=True)
    return (v - mu) * jax.lax.rsqrt(var + LN_EPS) * gamma + beta


def transformer_layer_kernel(
    alpha_ref,                                   # SMEM (2,): [alpha_attn, alpha_ff]
    x_ref,                                       # VMEM (Bt, S, H)
    wq_ref, bq_ref,                              # (H,H) bf16, (1,H) f32
    wkv_ref, bkv_ref,                            # (H,2H) bf16, (1,2H) f32  ([Wk|Wv])
    g1_ref, be1_ref,                             # attention LayerNorm gamma/beta (1,H)
    w1_ref, c1_ref, w2_ref, c2_ref,              # FFN (conv1d k=1 == linear)
    g2_ref, be2_ref,                             # FFN LayerNorm gamma/beta (1,H)
    o_ref,                                       # VMEM (Bt, S, H)
    *, num_heads,
):
    Bt, S, H = x_ref.shape
    nh = num_heads
    dh = H // nh

    # fold batch into the sublane dim for all per-position math
    x = x_ref[...].astype(jnp.float32).reshape(Bt * S, H)      # (Bt*S, H)

    # ---------------- multi-head self-attention (queries == keys == x) -------
    xn = _layer_norm(x, g1_ref[...], be1_ref[...])
    scale = 1.0 / jnp.sqrt(jnp.float32(dh))
    # fold 1/sqrt(dh) into Q once (applies to bias too, == scaling the scores)
    q = (jnp.dot(xn.astype(jnp.bfloat16), wq_ref[...],
                 preferred_element_type=jnp.float32) + bq_ref[...]) * scale
    kv = jnp.dot(x.astype(jnp.bfloat16), wkv_ref[...],
                 preferred_element_type=jnp.float32) + bkv_ref[...]
    k = kv[:, :H]
    v = kv[:, H:]

    def to_heads(t):                             # (Bt*S, H) -> (Bt*nh, S, dh) bf16
        t = t.reshape(Bt, S, nh, dh)
        t = jnp.swapaxes(t, 1, 2)                # (Bt, nh, S, dh)
        return t.reshape(Bt * nh, S, dh).astype(jnp.bfloat16)

    qh = to_heads(q)
    kh = to_heads(k)
    vh = to_heads(v)

    # padding masks: a position is padding iff its embedding row is all zeros
    row_abs = jnp.sum(jnp.abs(x), axis=-1, keepdims=True).reshape(Bt, S, 1)
    q_valid = (row_abs > 0.0).astype(jnp.float32)               # (Bt, S, 1)
    k_valid = jnp.swapaxes(row_abs, 1, 2) > 0.0                 # (Bt, 1, S)

    rows = jax.lax.broadcasted_iota(jnp.int32, (S, S), 0)
    cols = jax.lax.broadcasted_iota(jnp.int32, (S, S), 1)
    causal = cols <= rows                                       # (S, S)
    valid = jnp.logical_and(causal[None], k_valid)              # (Bt, S, S)
    bias = jnp.where(valid, 0.0, MASK_VAL)                      # additive mask

    bias_h = jnp.broadcast_to(bias[:, None], (Bt, nh, S, S)).reshape(Bt * nh, S, S)
    qmask_h = jnp.broadcast_to(q_valid[:, None], (Bt, nh, S, 1)).reshape(Bt * nh, S, 1)

    s = jnp.einsum("zqd,zkd->zqk", qh, kh,
                   preferred_element_type=jnp.float32) + bias_h
    s = s - jnp.max(s, axis=-1, keepdims=True)                  # keep max-subtraction
    p = jnp.exp(s)
    p = p * pl.reciprocal(jnp.sum(p, axis=-1, keepdims=True), approx=True)
    p = p * qmask_h                                             # query masking
    # attention dropout: identity (eval mode)

    ctx = jnp.einsum("zqk,zkd->zqd", p.astype(jnp.bfloat16), vh,
                     preferred_element_type=jnp.float32)        # (Bt*nh, S, dh)
    attn = jnp.swapaxes(ctx.reshape(Bt, nh, S, dh), 1, 2).reshape(Bt * S, H)

    alpha_attn = alpha_ref[0]
    x_attn = attn * alpha_attn + x               # scaled residual

    # ---------------- position-wise feedforward ------------------------------
    yn = _layer_norm(x_attn, g2_ref[...], be2_ref[...])
    h1 = jnp.maximum(
        jnp.dot(yn.astype(jnp.bfloat16), w1_ref[...],
                preferred_element_type=jnp.float32) + c1_ref[...], 0.0)
    h2 = jnp.dot(h1.astype(jnp.bfloat16), w2_ref[...],
                 preferred_element_type=jnp.float32) + c2_ref[...]
    alpha_ff = alpha_ref[1]
    out = h2 * alpha_ff + x_attn

    o_ref[...] = out.reshape(Bt, S, H).astype(o_ref.dtype)


def prepare_params(p):
    """One-time host-side param prep: fuse K/V weights, cast weights to bf16."""
    return {
        "alphas": p["alphas"].astype(jnp.float32),
        "wq": p["wq"].astype(jnp.bfloat16),
        "bq": p["bq"].astype(jnp.float32),
        "wkv": jnp.concatenate([p["wk"], p["wv"]], axis=1).astype(jnp.bfloat16),
        "bkv": jnp.concatenate([p["bk"], p["bv"]], axis=1).astype(jnp.float32),
        "g1": p["g1"].astype(jnp.float32), "be1": p["be1"].astype(jnp.float32),
        "w1": p["w1"].astype(jnp.bfloat16), "c1": p["c1"].astype(jnp.float32),
        "w2": p["w2"].astype(jnp.bfloat16), "c2": p["c2"].astype(jnp.float32),
        "g2": p["g2"].astype(jnp.float32), "be2": p["be2"].astype(jnp.float32),
    }


def transformer_layer(x, kp, num_heads, block_b=1):
    B, S, H = x.shape
    assert H % num_heads == 0
    assert B % block_b == 0

    x_spec = pl.BlockSpec((block_b, S, H), lambda b: (b, 0, 0))

    def const(shape):                       # constant-index (weight) spec
        return pl.BlockSpec(shape, lambda b: (0,) * len(shape))

    grid_spec = pltpu.PrefetchScalarGridSpec(
        num_scalar_prefetch=0,
        grid=(B // block_b,),
        in_specs=[
            pl.BlockSpec(memory_space=pltpu.MemorySpace.SMEM),   # alphas (2,)
            x_spec,
            const((H, H)), const((1, H)),            # Wq, bq
            const((H, 2 * H)), const((1, 2 * H)),    # [Wk|Wv], [bk|bv]
            const((1, H)), const((1, H)),            # ln1 gamma, beta
            const((H, H)), const((1, H)),            # W1, b1
            const((H, H)), const((1, H)),            # W2, b2
            const((1, H)), const((1, H)),            # ln2 gamma, beta
        ],
        out_specs=x_spec,
    )
    kernel = functools.partial(transformer_layer_kernel, num_heads=num_heads)
    return pl.pallas_call(
        kernel,
        out_shape=jax.ShapeDtypeStruct((B, S, H), x.dtype),
        grid_spec=grid_spec,
        compiler_params=pltpu.CompilerParams(dimension_semantics=("parallel",)),
    )(
        kp["alphas"], x,
        kp["wq"], kp["bq"], kp["wkv"], kp["bkv"],
        kp["g1"], kp["be1"],
        kp["w1"], kp["c1"], kp["w2"], kp["c2"],
        kp["g2"], kp["be2"],
    )


def reference(x, p, num_heads):
    """Pure-JAX (f32) reference of the same forward pass."""
    B, S, H = x.shape
    dh = H // num_heads

    def ln(v, g, b):
        mu = v.mean(-1, keepdims=True)
        var = ((v - mu) ** 2).mean(-1, keepdims=True)
        return (v - mu) * jax.lax.rsqrt(var + LN_EPS) * g + b

    xn = ln(x, p["g1"], p["be1"])
    Q = xn @ p["wq"] + p["bq"]
    K = x @ p["wk"] + p["bk"]
    V = x @ p["wv"] + p["bv"]
    Qh = Q.reshape(B, S, num_heads, dh).transpose(0, 2, 1, 3)
    Kh = K.reshape(B, S, num_heads, dh).transpose(0, 2, 1, 3)
    Vh = V.reshape(B, S, num_heads, dh).transpose(0, 2, 1, 3)

    s = jnp.einsum("bhqd,bhkd->bhqk", Qh, Kh,
                   precision=jax.lax.Precision.HIGHEST) / jnp.sqrt(jnp.float32(dh))
    pad_valid = jnp.abs(x).sum(-1) > 0                                    # (B, S)
    causal = jnp.tril(jnp.ones((S, S), bool))
    valid = causal[None, None] & pad_valid[:, None, None, :]
    s = jnp.where(valid, s, MASK_VAL)
    pm = jax.nn.softmax(s, axis=-1)
    pm = pm * pad_valid[:, None, :, None].astype(jnp.float32)             # query mask
    attn = jnp.einsum("bhqk,bhkd->bhqd", pm, Vh,
                      precision=jax.lax.Precision.HIGHEST)
    attn = attn.transpose(0, 2, 1, 3).reshape(B, S, H)
    x_attn = attn * p["alphas"][0] + x

    yn = ln(x_attn, p["g2"], p["be2"])
    h1 = jax.nn.relu(yn @ p["w1"] + p["c1"])
    h2 = h1 @ p["w2"] + p["c2"]
    return h2 * p["alphas"][1] + x_attn


def init_params(key, H):
    ks = jax.random.split(key, 12)

    def dense(k, shape, scale=0.05):
        return scale * jax.random.normal(k, shape, jnp.float32)

    return {
        "wq": dense(ks[0], (H, H)), "bq": dense(ks[1], (1, H), 0.01),
        "wk": dense(ks[2], (H, H)), "bk": dense(ks[3], (1, H), 0.01),
        "wv": dense(ks[4], (H, H)), "bv": dense(ks[5], (1, H), 0.01),
        "g1": jnp.ones((1, H), jnp.float32) + dense(ks[6], (1, H), 0.02),
        "be1": dense(ks[7], (1, H), 0.02),
        "w1": dense(ks[8], (H, H)), "c1": dense(ks[9], (1, H), 0.01),
        "w2": dense(ks[10], (H, H)), "c2": dense(ks[11], (1, H), 0.01),
        "g2": jnp.ones((1, H), jnp.float32),
        "be2": jnp.zeros((1, H), jnp.float32),
        "alphas": jnp.array([1.0, 1.0], jnp.float32),   # [alpha_attn, alpha_ff]
    }


if __name__ == "__main__":
    B, S, H, NUM_HEADS = 2, 16, 64, 2
    key = jax.random.PRNGKey(0)
    kx, kparam = jax.random.split(key)

    x = jax.random.normal(kx, (B, S, H), jnp.float32)
    x = x.at[1, 0, :].set(0.0)          # padded positions to exercise masking
    x = x.at[1, 1, :].set(0.0)
    params = init_params(kparam, H)
    kernel_params = prepare_params(params)

    out = jax.block_until_ready(transformer_layer(x, kernel_params, NUM_HEADS,
                                                  block_b=1))
    ref = jax.block_until_ready(reference(x, params, NUM_HEADS))

    assert out.shape == (B, S, H)
    # bf16 MXU operands (f32 accumulation) vs. f32 reference -> relaxed tolerance
    assert jnp.allclose(out, ref, rtol=5e-2, atol=5e-2), (
        f"mismatch vs reference: max abs err {jnp.max(jnp.abs(out - ref))}")

    print("KERNEL_OK")
</pallas_src>

<mosaic_0001>
module attributes {stable_mosaic.version = 11 : i64} {
  func.func @transformer_layer_kernel(%arg0: i32, %arg1: memref<2xf32, #tpu.memory_space<smem>>, %arg2: memref<1x16x64xf32, #tpu.memory_space<vmem>>, %arg3: memref<64x64xbf16, #tpu.memory_space<vmem>>, %arg4: memref<1x64xf32, #tpu.memory_space<vmem>>, %arg5: memref<64x128xbf16, #tpu.memory_space<vmem>>, %arg6: memref<1x128xf32, #tpu.memory_space<vmem>>, %arg7: memref<1x64xf32, #tpu.memory_space<vmem>>, %arg8: memref<1x64xf32, #tpu.memory_space<vmem>>, %arg9: memref<64x64xbf16, #tpu.memory_space<vmem>>, %arg10: memref<1x64xf32, #tpu.memory_space<vmem>>, %arg11: memref<64x64xbf16, #tpu.memory_space<vmem>>, %arg12: memref<1x64xf32, #tpu.memory_space<vmem>>, %arg13: memref<1x64xf32, #tpu.memory_space<vmem>>, %arg14: memref<1x64xf32, #tpu.memory_space<vmem>>, %arg15: memref<1x16x64xf32, #tpu.memory_space<vmem>>) attributes {dimension_semantics = [#tpu.dimension_semantics<parallel>], iteration_bounds = array<i64: 2>, scalar_prefetch = 0 : i64, scratch_operands = 0 : i64, tpu.core_type = #tpu.core_type<tc>, window_params = [{transform_indices = @transform_0, window_bounds = array<i64: 2>}, {transform_indices = @transform_1, window_bounds = array<i64: 1, 16, 64>}, {pipeline_mode = #tpu.pipeline_mode<synchronous>, transform_indices = @transform_2, window_bounds = array<i64: 64, 64>}, {pipeline_mode = #tpu.pipeline_mode<synchronous>, transform_indices = @transform_3, window_bounds = array<i64: 1, 64>}, {pipeline_mode = #tpu.pipeline_mode<synchronous>, transform_indices = @transform_4, window_bounds = array<i64: 64, 128>}, {pipeline_mode = #tpu.pipeline_mode<synchronous>, transform_indices = @transform_5, window_bounds = array<i64: 1, 128>}, {pipeline_mode = #tpu.pipeline_mode<synchronous>, transform_indices = @transform_6, window_bounds = array<i64: 1, 64>}, {pipeline_mode = #tpu.pipeline_mode<synchronous>, transform_indices = @transform_7, window_bounds = array<i64: 1, 64>}, {pipeline_mode = #tpu.pipeline_mode<synchronous>, transform_indices = @transform_8, window_bounds = array<i64: 64, 64>}, {pipeline_mode = #tpu.pipeline_mode<synchronous>, transform_indices = @transform_9, window_bounds = array<i64: 1, 64>}, {pipeline_mode = #tpu.pipeline_mode<synchronous>, transform_indices = @transform_10, window_bounds = array<i64: 64, 64>}, {pipeline_mode = #tpu.pipeline_mode<synchronous>, transform_indices = @transform_11, window_bounds = array<i64: 1, 64>}, {pipeline_mode = #tpu.pipeline_mode<synchronous>, transform_indices = @transform_12, window_bounds = array<i64: 1, 64>}, {pipeline_mode = #tpu.pipeline_mode<synchronous>, transform_indices = @transform_13, window_bounds = array<i64: 1, 64>}, {transform_indices = @transform_14, window_bounds = array<i64: 1, 16, 64>}]} {
    %c0 = arith.constant 0 : index
    %c0_0 = arith.constant 0 : index
    %c0_1 = arith.constant 0 : index
    %0 = vector.load %arg2[%c0, %c0_0, %c0_1] : memref<1x16x64xf32, #tpu.memory_space<vmem>>, vector<1x16x64xf32>
    %1 = vector.shape_cast %0 : vector<1x16x64xf32> to vector<16x64xf32>
    %c0_2 = arith.constant 0 : index
    %c0_3 = arith.constant 0 : index
    %2 = vector.load %arg7[%c0_2, %c0_3] : memref<1x64xf32, #tpu.memory_space<vmem>>, vector<1x64xf32>
    %c0_4 = arith.constant 0 : index
    %c0_5 = arith.constant 0 : index
    %3 = vector.load %arg8[%c0_4, %c0_5] : memref<1x64xf32, #tpu.memory_space<vmem>>, vector<1x64xf32>
    %cst = arith.constant dense<0.000000e+00> : vector<16xf32>
    %4 = vector.multi_reduction <add>, %1, %cst [1] : vector<16x64xf32> to vector<16xf32>
    %5 = vector.shape_cast %4 : vector<16xf32> to vector<16x1xf32>
    %cst_6 = arith.constant 6.400000e+01 : f32
    %6 = vector.broadcast %cst_6 : f32 to vector<16x1xf32>
    %7 = arith.divf %5, %6 : vector<16x1xf32>
    %8 = vector.broadcast %7 : vector<16x1xf32> to vector<16x64xf32>
    %9 = arith.subf %1, %8 : vector<16x64xf32>
    %10 = arith.mulf %9, %9 : vector<16x64xf32>
    %cst_7 = arith.constant dense<0.000000e+00> : vector<16xf32>
    %11 = vector.multi_reduction <add>, %10, %cst_7 [1] : vector<16x64xf32> to vector<16xf32>
    %12 = vector.shape_cast %11 : vector<16xf32> to vector<16x1xf32>
    %cst_8 = arith.constant 6.400000e+01 : f32
    %13 = vector.broadcast %cst_8 : f32 to vector<16x1xf32>
    %14 = arith.divf %12, %13 : vector<16x1xf32>
    %15 = vector.broadcast %7 : vector<16x1xf32> to vector<16x64xf32>
    %16 = arith.subf %1, %15 : vector<16x64xf32>
    %cst_9 = arith.constant 9.99999993E-9 : f32
    %17 = vector.broadcast %cst_9 : f32 to vector<16x1xf32>
    %18 = arith.addf %14, %17 : vector<16x1xf32>
    %19 = math.rsqrt %18 : vector<16x1xf32>
    %20 = vector.broadcast %19 : vector<16x1xf32> to vector<16x64xf32>
    %21 = arith.mulf %16, %20 : vector<16x64xf32>
    %22 = vector.broadcast %2 : vector<1x64xf32> to vector<16x64xf32>
    %23 = arith.mulf %21, %22 : vector<16x64xf32>
    %24 = vector.broadcast %3 : vector<1x64xf32> to vector<16x64xf32>
    %25 = arith.addf %23, %24 : vector<16x64xf32>
    %cst_10 = arith.constant 3.200000e+01 : f32
    %26 = math.sqrt %cst_10 : f32
    %cst_11 = arith.constant 1.000000e+00 : f32
    %27 = arith.divf %cst_11, %26 : f32
    %28 = arith.truncf %25 : vector<16x64xf32> to vector<16x64xbf16>
    %c0_12 = arith.constant 0 : index
    %c0_13 = arith.constant 0 : index
    %29 = vector.load %arg3[%c0_12, %c0_13] : memref<64x64xbf16, #tpu.memory_space<vmem>>, vector<64x64xbf16>
    %cst_14 = arith.constant dense<0.000000e+00> : vector<16x64xf32>
    %30 = tpu.matmul %28, %29, %cst_14 {dimension_numbers = #tpu.dot_dimension_numbers<[1], [0], [0], [1], [0, 0, 1, 1], [], []>} : vector<16x64xbf16>, vector<64x64xbf16>, vector<16x64xf32> -> vector<16x64xf32>
    %c0_15 = arith.constant 0 : index
    %c0_16 = arith.constant 0 : index
    %31 = vector.load %arg4[%c0_15, %c0_16] : memref<1x64xf32, #tpu.memory_space<vmem>>, vector<1x64xf32>
    %32 = vector.broadcast %31 : vector<1x64xf32> to vector<16x64xf32>
    %33 = arith.addf %30, %32 : vector<16x64xf32>
    %34 = vector.broadcast %27 : f32 to vector<16x64xf32>
    %35 = arith.mulf %33, %34 : vector<16x64xf32>
    %36 = arith.truncf %1 : vector<16x64xf32> to vector<16x64xbf16>
    %c0_17 = arith.constant 0 : index
    %c0_18 = arith.constant 0 : index
    %37 = vector.load %arg5[%c0_17, %c0_18] : memref<64x128xbf16, #tpu.memory_space<vmem>>, vector<64x128xbf16>
    %cst_19 = arith.constant dense<0.000000e+00> : vector<16x128xf32>
    %38 = tpu.matmul %36, %37, %cst_19 {dimension_numbers = #tpu.dot_dimension_numbers<[1], [0], [0], [1], [0, 0, 1, 1], [], []>} : vector<16x64xbf16>, vector<64x128xbf16>, vector<16x128xf32> -> vector<16x128xf32>
    %c0_20 = arith.constant 0 : index
    %c0_21 = arith.constant 0 : index
    %39 = vector.load %arg6[%c0_20, %c0_21] : memref<1x128xf32, #tpu.memory_space<vmem>>, vector<1x128xf32>
    %40 = vector.broadcast %39 : vector<1x128xf32> to vector<16x128xf32>
    %41 = arith.addf %38, %40 : vector<16x128xf32>
    %42 = vector.extract_strided_slice %41 {offsets = [0, 0], sizes = [16, 64], strides = [1, 1]} : vector<16x128xf32> to vector<16x64xf32>
    %43 = vector.extract_strided_slice %41 {offsets = [0, 64], sizes = [16, 64], strides = [1, 1]} : vector<16x128xf32> to vector<16x64xf32>
    %44 = vector.shape_cast %35 : vector<16x64xf32> to vector<1x16x2x32xf32>
    %45 = tpu.transpose %44, [0, 2, 1, 3] : vector<1x16x2x32xf32> -> vector<1x2x16x32xf32>
    %46 = vector.shape_cast %45 : vector<1x2x16x32xf32> to vector<2x16x32xf32>
    %47 = arith.truncf %46 : vector<2x16x32xf32> to vector<2x16x32xbf16>
    %48 = vector.shape_cast %42 : vector<16x64xf32> to vector<1x16x2x32xf32>
    %49 = tpu.transpose %48, [0, 2, 1, 3] : vector<1x16x2x32xf32> -> vector<1x2x16x32xf32>
    %50 = vector.shape_cast %49 : vector<1x2x16x32xf32> to vector<2x16x32xf32>
    %51 = arith.truncf %50 : vector<2x16x32xf32> to vector<2x16x32xbf16>
    %52 = vector.shape_cast %43 : vector<16x64xf32> to vector<1x16x2x32xf32>
    %53 = tpu.transpose %52, [0, 2, 1, 3] : vector<1x16x2x32xf32> -> vector<1x2x16x32xf32>
    %54 = vector.shape_cast %53 : vector<1x2x16x32xf32> to vector<2x16x32xf32>
    %55 = arith.truncf %54 : vector<2x16x32xf32> to vector<2x16x32xbf16>
    %56 = math.absf %1 : vector<16x64xf32>
    %cst_22 = arith.constant dense<0.000000e+00> : vector<16xf32>
    %57 = vector.multi_reduction <add>, %56, %cst_22 [1] : vector<16x64xf32> to vector<16xf32>
    %58 = vector.shape_cast %57 : vector<16xf32> to vector<16x1xf32>
    %59 = vector.shape_cast %58 : vector<16x1xf32> to vector<1x16x1xf32>
    %cst_23 = arith.constant 0.000000e+00 : f32
    %60 = vector.broadcast %cst_23 : f32 to vector<1x16x1xf32>
    %61 = arith.cmpf ogt, %59, %60 : vector<1x16x1xf32>
    %62 = arith.extui %61 : vector<1x16x1xi1> to vector<1x16x1xi32>
    %63 = arith.sitofp %62 : vector<1x16x1xi32> to vector<1x16x1xf32>
    %64 = tpu.transpose %59, [0, 2, 1] : vector<1x16x1xf32> -> vector<1x1x16xf32>
    %cst_24 = arith.constant 0.000000e+00 : f32
    %65 = vector.broadcast %cst_24 : f32 to vector<1x1x16xf32>
    %66 = arith.cmpf ogt, %64, %65 : vector<1x1x16xf32>
    %67 = tpu.iota {dimensions = array<i32: 0>} : vector<16x16xi32>
    %68 = tpu.iota {dimensions = array<i32: 1>} : vector<16x16xi32>
    %69 = arith.cmpi sle, %68, %67 : vector<16x16xi32>
    %70 = vector.shape_cast %69 : vector<16x16xi1> to vector<1x16x16xi1>
    %71 = vector.broadcast %66 : vector<1x1x16xi1> to vector<1x16x16xi1>
    %72 = arith.andi %70, %71 : vector<1x16x16xi1>
    %cst_25 = arith.constant 0.000000e+00 : f32
    %cst_26 = arith.constant -4.2949673E+9 : f32
    %73 = vector.broadcast %cst_25 : f32 to vector<1x16x16xf32>
    %74 = vector.broadcast %cst_26 : f32 to vector<1x16x16xf32>
    %75 = arith.select %72, %73, %74 : vector<1x16x16xi1>, vector<1x16x16xf32>
    %76 = vector.shape_cast %75 : vector<1x16x16xf32> to vector<1x1x16x16xf32>
    %77 = vector.shape_cast %76 : vector<1x1x16x16xf32> to vector<1x1x16x16xf32>
    %78 = vector.broadcast %77 : vector<1x1x16x16xf32> to vector<1x2x16x16xf32>
    %79 = vector.shape_cast %78 : vector<1x2x16x16xf32> to vector<2x16x16xf32>
    %80 = vector.shape_cast %63 : vector<1x16x1xf32> to vector<1x1x16x1xf32>
    %81 = vector.shape_cast %80 : vector<1x1x16x1xf32> to vector<1x1x16x1xf32>
    %82 = vector.broadcast %81 : vector<1x1x16x1xf32> to vector<1x2x16x1xf32>
    %83 = vector.shape_cast %82 : vector<1x2x16x1xf32> to vector<2x16x1xf32>
    "tpu.trace_start"() <{level = 10 : i32, message = "zqd,zkd->zqk"}> : () -> ()
    %cst_27 = arith.constant dense<0.000000e+00> : vector<2x16x16xf32>
    %84 = tpu.matmul %47, %51, %cst_27 {dimension_numbers = #tpu.dot_dimension_numbers<[2], [2], [1], [1], [0, 0, 0, 1, 1, 1], [0], [0]>} : vector<2x16x32xbf16>, vector<2x16x32xbf16>, vector<2x16x16xf32> -> vector<2x16x16xf32>
    "tpu.trace_stop"() : () -> ()
    %85 = arith.addf %84, %79 : vector<2x16x16xf32>
    %cst_28 = arith.constant dense<0xFF800000> : vector<2x16xf32>
    %86 = vector.multi_reduction <maximumf>, %85, %cst_28 [2] : vector<2x16x16xf32> to vector<2x16xf32>
    %87 = vector.shape_cast %86 : vector<2x16xf32> to vector<2x16x1xf32>
    %88 = vector.broadcast %87 : vector<2x16x1xf32> to vector<2x16x16xf32>
    %89 = arith.subf %85, %88 : vector<2x16x16xf32>
    %90 = math.exp %89 : vector<2x16x16xf32>
    %cst_29 = arith.constant dense<0.000000e+00> : vector<2x16xf32>
    %91 = vector.multi_reduction <add>, %90, %cst_29 [2] : vector<2x16x16xf32> to vector<2x16xf32>
    %92 = vector.shape_cast %91 : vector<2x16xf32> to vector<2x16x1xf32>
    %93 = tpu.reciprocal %92 {approx = true} : vector<2x16x1xf32> -> vector<2x16x1xf32>
    %94 = vector.broadcast %93 : vector<2x16x1xf32> to vector<2x16x16xf32>
    %95 = arith.mulf %90, %94 : vector<2x16x16xf32>
    %96 = vector.broadcast %83 : vector<2x16x1xf32> to vector<2x16x16xf32>
    %97 = arith.mulf %95, %96 : vector<2x16x16xf32>
    %98 = arith.truncf %97 : vector<2x16x16xf32> to vector<2x16x16xbf16>
    "tpu.trace_start"() <{level = 10 : i32, message = "zqk,zkd->zqd"}> : () -> ()
    %cst_30 = arith.constant dense<0.000000e+00> : vector<2x16x32xf32>
    %99 = tpu.matmul %98, %55, %cst_30 {dimension_numbers = #tpu.dot_dimension_numbers<[2], [1], [1], [2], [0, 0, 0, 1, 1, 2], [0], [0]>} : vector<2x16x16xbf16>, vector<2x16x32xbf16>, vector<2x16x32xf32> -> vector<2x16x32xf32>
    "tpu.trace_stop"() : () -> ()
    %100 = vector.shape_cast %99 : vector<2x16x32xf32> to vector<1x2x16x32xf32>
    %101 = tpu.transpose %100, [0, 2, 1, 3] : vector<1x2x16x32xf32> -> vector<1x16x2x32xf32>
    %102 = vector.shape_cast %101 : vector<1x16x2x32xf32> to vector<16x64xf32>
    %c0_31 = arith.constant 0 : index
    %103 = memref.load %arg1[%c0_31] : memref<2xf32, #tpu.memory_space<smem>>
    %104 = vector.broadcast %103 : f32 to vector<16x64xf32>
    %105 = arith.mulf %102, %104 : vector<16x64xf32>
    %106 = arith.addf %105, %1 : vector<16x64xf32>
    %c0_32 = arith.constant 0 : index
    %c0_33 = arith.constant 0 : index
    %107 = vector.load %arg13[%c0_32, %c0_33] : memref<1x64xf32, #tpu.memory_space<vmem>>, vector<1x64xf32>
    %c0_34 = arith.constant 0 : index
    %c0_35 = arith.constant 0 : index
    %108 = vector.load %arg14[%c0_34, %c0_35] : memref<1x64xf32, #tpu.memory_space<vmem>>, vector<1x64xf32>
    %cst_36 = arith.constant dense<0.000000e+00> : vector<16xf32>
    %109 = vector.multi_reduction <add>, %106, %cst_36 [1] : vector<16x64xf32> to vector<16xf32>
    %110 = vector.shape_cast %109 : vector<16xf32> to vector<16x1xf32>
    %cst_37 = arith.constant 6.400000e+01 : f32
    %111 = vector.broadcast %cst_37 : f32 to vector<16x1xf32>
    %112 = arith.divf %110, %111 : vector<16x1xf32>
    %113 = vector.broadcast %112 : vector<16x1xf32> to vector<16x64xf32>
    %114 = arith.subf %106, %113 : vector<16x64xf32>
    %115 = arith.mulf %114, %114 : vector<16x64xf32>
    %cst_38 = arith.constant dense<0.000000e+00> : vector<16xf32>
    %116 = vector.multi_reduction <add>, %115, %cst_38 [1] : vector<16x64xf32> to vector<16xf32>
    %117 = vector.shape_cast %116 : vector<16xf32> to vector<16x1xf32>
    %cst_39 = arith.constant 6.400000e+01 : f32
    %118 = vector.broadcast %cst_39 : f32 to vector<16x1xf32>
    %119 = arith.divf %117, %118 : vector<16x1xf32>
    %120 = vector.broadcast %112 : vector<16x1xf32> to vector<16x64xf32>
    %121 = arith.subf %106, %120 : vector<16x64xf32>
    %cst_40 = arith.constant 9.99999993E-9 : f32
    %122 = vector.broadcast %cst_40 : f32 to vector<16x1xf32>
    %123 = arith.addf %119, %122 : vector<16x1xf32>
    %124 = math.rsqrt %123 : vector<16x1xf32>
    %125 = vector.broadcast %124 : vector<16x1xf32> to vector<16x64xf32>
    %126 = arith.mulf %121, %125 : vector<16x64xf32>
    %127 = vector.broadcast %107 : vector<1x64xf32> to vector<16x64xf32>
    %128 = arith.mulf %126, %127 : vector<16x64xf32>
    %129 = vector.broadcast %108 : vector<1x64xf32> to vector<16x64xf32>
    %130 = arith.addf %128, %129 : vector<16x64xf32>
    %131 = arith.truncf %130 : vector<16x64xf32> to vector<16x64xbf16>
    %c0_41 = arith.constant 0 : index
    %c0_42 = arith.constant 0 : index
    %132 = vector.load %arg9[%c0_41, %c0_42] : memref<64x64xbf16, #tpu.memory_space<vmem>>, vector<64x64xbf16>
    %cst_43 = arith.constant dense<0.000000e+00> : vector<16x64xf32>
    %133 = tpu.matmul %131, %132, %cst_43 {dimension_numbers = #tpu.dot_dimension_numbers<[1], [0], [0], [1], [0, 0, 1, 1], [], []>} : vector<16x64xbf16>, vector<64x64xbf16>, vector<16x64xf32> -> vector<16x64xf32>
    %c0_44 = arith.constant 0 : index
    %c0_45 = arith.constant 0 : index
    %134 = vector.load %arg10[%c0_44, %c0_45] : memref<1x64xf32, #tpu.memory_space<vmem>>, vector<1x64xf32>
    %135 = vector.broadcast %134 : vector<1x64xf32> to vector<16x64xf32>
    %136 = arith.addf %133, %135 : vector<16x64xf32>
    %cst_46 = arith.constant 0.000000e+00 : f32
    %137 = vector.broadcast %cst_46 : f32 to vector<16x64xf32>
    %138 = arith.maximumf %136, %137 : vector<16x64xf32>
    %139 = arith.truncf %138 : vector<16x64xf32> to vector<16x64xbf16>
    %c0_47 = arith.constant 0 : index
    %c0_48 = arith.constant 0 : index
    %140 = vector.load %arg11[%c0_47, %c0_48] : memref<64x64xbf16, #tpu.memory_space<vmem>>, vector<64x64xbf16>
    %cst_49 = arith.constant dense<0.000000e+00> : vector<16x64xf32>
    %141 = tpu.matmul %139, %140, %cst_49 {dimension_numbers = #tpu.dot_dimension_numbers<[1], [0], [0], [1], [0, 0, 1, 1], [], []>} : vector<16x64xbf16>, vector<64x64xbf16>, vector<16x64xf32> -> vector<16x64xf32>
    %c0_50 = arith.constant 0 : index
    %c0_51 = arith.constant 0 : index
    %142 = vector.load %arg12[%c0_50, %c0_51] : memref<1x64xf32, #tpu.memory_space<vmem>>, vector<1x64xf32>
    %143 = vector.broadcast %142 : vector<1x64xf32> to vector<16x64xf32>
    %144 = arith.addf %141, %143 : vector<16x64xf32>
    %c1 = arith.constant 1 : index
    %145 = memref.load %arg1[%c1] : memref<2xf32, #tpu.memory_space<smem>>
    %146 = vector.broadcast %145 : f32 to vector<16x64xf32>
    %147 = arith.mulf %144, %146 : vector<16x64xf32>
    %148 = arith.addf %147, %106 : vector<16x64xf32>
    %149 = vector.shape_cast %148 : vector<16x64xf32> to vector<1x16x64xf32>
    %c0_52 = arith.constant 0 : index
    %c0_53 = arith.constant 0 : index
    %c0_54 = arith.constant 0 : index
    %150 = vector.load %arg15[%c0_52, %c0_53, %c0_54] : memref<1x16x64xf32, #tpu.memory_space<vmem>>, vector<1x16x64xf32>
    tpu.vector_store %arg15[%c0_52, %c0_53, %c0_54], %149 {strides = array<i32>} : memref<1x16x64xf32, #tpu.memory_space<vmem>>, vector<1x16x64xf32>,
    return
  }
  func.func @transform_0(%arg0: i32) -> i32 {
    %c0_i32 = arith.constant 0 : i32
    %c0_i32_0 = arith.constant 0 : i32
    return %c0_i32 : i32
  }
  func.func @transform_1(%arg0: i32) -> (i32, i32, i32) {
    %c0_i32 = arith.constant 0 : i32
    %c0_i32_0 = arith.constant 0 : i32
    %c0_i32_1 = arith.constant 0 : i32
    return %arg0, %c0_i32, %c0_i32_0 : i32, i32, i32
  }
  func.func @transform_2(%arg0: i32) -> (i32, i32) {
    %c0_i32 = arith.constant 0 : i32
    %c0_i32_0 = arith.constant 0 : i32
    %c0_i32_1 = arith.constant 0 : i32
    return %c0_i32, %c0_i32_0 : i32, i32
  }
  func.func @transform_3(%arg0: i32) -> (i32, i32) {
    %c0_i32 = arith.constant 0 : i32
    %c0_i32_0 = arith.constant 0 : i32
    %c0_i32_1 = arith.constant 0 : i32
    return %c0_i32, %c0_i32_0 : i32, i32
  }
  func.func @transform_4(%arg0: i32) -> (i32, i32) {
    %c0_i32 = arith.constant 0 : i32
    %c0_i32_0 = arith.constant 0 : i32
    %c0_i32_1 = arith.constant 0 : i32
    return %c0_i32, %c0_i32_0 : i32, i32
  }
  func.func @transform_5(%arg0: i32) -> (i32, i32) {
    %c0_i32 = arith.constant 0 : i32
    %c0_i32_0 = arith.constant 0 : i32
    %c0_i32_1 = arith.constant 0 : i32
    return %c0_i32, %c0_i32_0 : i32, i32
  }
  func.func @transform_6(%arg0: i32) -> (i32, i32) {
    %c0_i32 = arith.constant 0 : i32
    %c0_i32_0 = arith.constant 0 : i32
    %c0_i32_1 = arith.constant 0 : i32
    return %c0_i32, %c0_i32_0 : i32, i32
  }
  func.func @transform_7(%arg0: i32) -> (i32, i32) {
    %c0_i32 = arith.constant 0 : i32
    %c0_i32_0 = arith.constant 0 : i32
    %c0_i32_1 = arith.constant 0 : i32
    return %c0_i32, %c0_i32_0 : i32, i32
  }
  func.func @transform_8(%arg0: i32) -> (i32, i32) {
    %c0_i32 = arith.constant 0 : i32
    %c0_i32_0 = arith.constant 0 : i32
    %c0_i32_1 = arith.constant 0 : i32
    return %c0_i32, %c0_i32_0 : i32, i32
  }
  func.func @transform_9(%arg0: i32) -> (i32, i32) {
    %c0_i32 = arith.constant 0 : i32
    %c0_i32_0 = arith.constant 0 : i32
    %c0_i32_1 = arith.constant 0 : i32
    return %c0_i32, %c0_i32_0 : i32, i32
  }
  func.func @transform_10(%arg0: i32) -> (i32, i32) {
    %c0_i32 = arith.constant 0 : i32
    %c0_i32_0 = arith.constant 0 : i32
    %c0_i32_1 = arith.constant 0 : i32
    return %c0_i32, %c0_i32_0 : i32, i32
  }
  func.func @transform_11(%arg0: i32) -> (i32, i32) {
    %c0_i32 = arith.constant 0 : i32
    %c0_i32_0 = arith.constant 0 : i32
    %c0_i32_1 = arith.constant 0 : i32
    return %c0_i32, %c0_i32_0 : i32, i32
  }
  func.func @transform_12(%arg0: i32) -> (i32, i32) {
    %c0_i32 = arith.constant 0 : i32
    %c0_i32_0 = arith.constant 0 : i32
    %c0_i32_1 = arith.constant 0 : i32
    return %c0_i32, %c0_i32_0 : i32, i32
  }
  func.func @transform_13(%arg0: i32) -> (i32, i32) {
    %c0_i32 = arith.constant 0 : i32
    %c0_i32_0 = arith.constant 0 : i32
    %c0_i32_1 = arith.constant 0 : i32
    return %c0_i32, %c0_i32_0 : i32, i32
  }
  func.func @transform_14(%arg0: i32) -> (i32, i32, i32) {
    %c0_i32 = arith.constant 0 : i32
    %c0_i32_0 = arith.constant 0 : i32
    %c0_i32_1 = arith.constant 0 : i32
    return %arg0, %c0_i32, %c0_i32_0 : i32, i32, i32
  }
}

</mosaic_0001>

<bundles_post_ra>
// kernel: tpu_custom_call.1
= control target key start
LH: loop header
LB: loop body
LE: loop exit
PB: predicated region body
PF: predicated region fallthrough
CT: control target
= control target key end

     0   :  { %s3260_s0 = inlined_call_operand.hbm [shape: f32[2], index: 0, kind: input, shape index: {}]   ;;  %s3261_s1 = inlined_call_operand.hbm [shape: f32[2,16,64], index: 1, kind: input, shape index: {}]   ;;  %s3262_s2 = inlined_call_operand.hbm [shape: bf16[64,64], index: 2, kind: input, shape index: {}]   ;;  %s3263_s3 = inlined_call_operand.vmem [shape: f32[1,64], index: 3, kind: input, shape index: {}]   ;;  %s3264_s4 = inlined_call_operand.hbm [shape: bf16[64,128], index: 4, kind: input, shape index: {}]   ;;  %s3265_s5 = inlined_call_operand.vmem [shape: f32[1,128], index: 5, kind: input, shape index: {}]   ;;  %s3266_s6 = inlined_call_operand.vmem [shape: f32[1,64], index: 6, kind: input, shape index: {}]   ;;  %s3267_s7 = inlined_call_operand.vmem [shape: f32[1,64], index: 7, kind: input, shape index: {}]   ;;  %s3268_s8 = inlined_call_operand.hbm [shape: bf16[64,64], index: 8, kind: input, shape index: {}]   ;;  %s3269_s9 = inlined_call_operand.vmem [shape: f32[1,64], index: 9, kind: input, shape index: {}]   ;;  %s3270_s10 = inlined_call_operand.hbm [shape: bf16[64,64], index: 10, kind: input, shape index: {}]   ;;  %s3271_s11 = inlined_call_operand.vmem [shape: f32[1,64], index: 11, kind: input, shape index: {}]   ;;  %s3272_s12 = inlined_call_operand.vmem [shape: f32[1,64], index: 12, kind: input, shape index: {}]   ;;  %s3273_s13 = inlined_call_operand.vmem [shape: f32[1,64], index: 13, kind: input, shape index: {}]   ;;  %s3274_s14 = inlined_call_operand.hbm [shape: f32[2,16,64], index: 14, kind: output, shape index: {}]  }
   0x1   :  { %3277 = sst [smem:[#allocation21_spill]] %s3260_s0 }
   0x2   :  { %3278 = sst [smem:[#allocation22_spill]] %s3262_s2 }
   0x3   :  { %3279 = sst [smem:[#allocation23_spill]] %s3264_s4 }
   0x4   :  { %3280 = sst [smem:[#allocation24_spill]] %s3268_s8 }
   0x5   :  { %3281 = sst [smem:[#allocation25_spill]] %s3270_s10 }
   0x6   :  { %3282 = sst [smem:[#allocation26_spill]] %s3271_s11 }
   0x7   :  { %3283 = sst [smem:[#allocation27_spill]] %s3274_s14 }
   0x8   :  { %19 = vsyncpa [#allocation5], 0 }
   0x9   :  { %20 = vsyncpa [#allocation3], 0 }
   0xa   :  { %22 = vsyncpa [#allocation3 + $0x1], 0 }
   0xb   :  { %23 = vsyncpa [#allocation8], 0 }
   0xc   :  { %24 = vsyncpa [#allocation11], 0 }
   0xd   :  { %25 = vsyncpa [#allocation4], 0 }
   0xe   :  { %27 = vsyncpa [#allocation4 + $0x1], 0  ;;  %s2691_s29 = smov 0   ;;  %s2693_s30 = smov 0  }
   0xf   :  { %s2695_s15 = smov 0   ;;  %s2697_s16 = smov 0  }
  0x10 LB: > { %3284 = sst [smem:[#allocation19_spill]] %s2590_s15  ;;  %s2715_s20 = sadd.s32 4294967295, %s2594_s16   ;;  %s2594_s16 = sphi %s2697_s16, %s3305_s16   ;;  %s2590_s15 = sphi %s2695_s15, %s3302_s15   ;;  %s2586_s30 = sphi %s2693_s30, %s3304_s30   ;;  %s2582_s29 = sphi %s2691_s29, %s3303_s29  }
  0x11   : > { %s3285_s2 = sld [smem:[#allocation22_spill]]  ;;  %p2067_p0 = scmp.ge.s32.totalorder %s2594_s16, 1 }
  0x12   : > { %p75_p1 = scmp.eq.s32.totalorder %s2715_s20, 0  ;;  %p363_p2 = scmp.lt.s32.totalorder %s2594_s16, 3 }
  0x13   : > { %s2596_s22 = smov [#allocation7]   ;;  %s3287_s8 = sld [smem:[#allocation24_spill]] }
  0x14   : > { %p2720_p3 = pnand %p2067_p0, %p363_p2  ;;  %s386_s23 = sshll.u32 %s2596_s22, 4  ;;  %s387_s23 = int_to_ptr.vmem [resolvable:$true] %s386_s23 }
  0x15   : > { %s3289_s0 = sld [smem:[#allocation21_spill]]  ;;  %s2597_s22 = smov [#allocation10]  }
  0x16   : > { %p2207_p4 = pneg %p2720_p3  ;;  %s2598_s14 = smov 64  }
  0x17   : > { %s384_s19 = sshll.u32 %s3285_s2, 4  ;;  %s426_s2 = sshll.u32 %s2597_s22, 4  ;;  %s385_s19 = int_to_ptr.hbm [resolvable:$true] %s384_s19  ;;  %s427_s2 = int_to_ptr.vmem [resolvable:$true] %s426_s2 }
  0x18   : > { %p2732_p6 = pnand %p2207_p4, %p75_p1  ;;  %s2599_s11 = smov 4  }
  0x19   : > { %s424_s26 = sshll.u32 %s3287_s8, 4  ;;  %s3290_s4 = sld [smem:[#allocation23_spill]]  ;;  %s425_s26 = int_to_ptr.hbm [resolvable:$true] %s424_s26 }
  0x1a   : > { %2213 = dma.hbm_to_vmem [thread:$0]  (!%p2732_p6), %s385_s19, 512, %s387_s23, [#allocation8], %s2598_s14, %s2598_s14, %s2599_s11  }
  0x1b   : > { %s375_s18 = sshll.u32 %s3289_s0, 4  ;;  %s2600_s28 = smov [#allocation2]   ;;  %s376_s18 = int_to_ptr.hbm [resolvable:$true] %s375_s18 }
  0x1c   : > { %2219 = dma.hbm_to_vmem [thread:$0]  (!%p2732_p6), %s425_s26, 512, %s427_s2, [#allocation11], %s2598_s14, %s2598_s14, %s2599_s11  }
  0x1d   : > { %2210 = dma.hbm_to_smem (!%p2732_p6), %s376_s18, 16, %s2600_s28, [#allocation5]  }
  0x1e   : > { %s2601_s19 = smov [#allocation9]   ;;  %s3291_s10 = sld [smem:[#allocation25_spill]] }
  0x1f   : > { %s401_s8 = sshll.u32 %s3290_s4, 4  ;;  %s403_s23 = sshll.u32 %s2601_s19, 4  ;;  %s402_s8 = int_to_ptr.hbm [resolvable:$true] %s401_s8  ;;  %s404_s23 = int_to_ptr.vmem [resolvable:$true] %s403_s23 }
  0x20   : > { %2216 = dma.hbm_to_vmem [thread:$0]  (!%p2732_p6), %s402_s8, 512, %s404_s23, [#allocation8], %s2598_s14, %s2598_s14, %s2599_s11  }
  0x21   : > { %s2602_s26 = smov [#allocation12]   ;;  %s2066_s24 = sadd.s32 4294967294, %s2594_s16  }
  0x22   : > { %s443_s18 = sshll.u32 %s2602_s26, 4  ;;  %s2757_s25 = sadd.s32 1, %s2594_s16   ;;  %s444_s18 = int_to_ptr.vmem [resolvable:$true] %s443_s18 }
  0x23   : > { %s61_s28 = sadd.s32 1, %s2590_s15  ;;  %s58_s19 = ssub.s32 %s2594_s16, %s2757_s25 }
  0x24   : > { %s441_s2 = sshll.u32 %s3291_s10, 4  ;;  %p68_p7 = scmp.ne.s32.totalorder %s2590_s15, %s2586_s30  ;;  %s442_s2 = int_to_ptr.hbm [resolvable:$true] %s441_s2 }
  0x25   : > { %2222 = dma.hbm_to_vmem [thread:$0]  (!%p2732_p6), %s442_s2, 512, %s444_s18, [#allocation11], %s2598_s14, %s2598_s14, %s2599_s11  }
  0x26   : > { %p59_p8 = scmp.eq.s32.totalorder %s58_s19, 0  ;;  %p69_p9 = scmp.eq.s32.totalorder %s2594_s16, 0 }
  0x27   : > { %p74_p10 = scmp.ne.s32.totalorder %s2586_s30, %s2582_s29  ;;  %p350_p11 = scmp.eq.s32.totalorder %s2715_s20, 1 }
  0x28   : > { %s2769_s8 = scalar_select %p59_p8, %s2590_s15, %s61_s28  }
  0x29   : > { %p2771_p12 = por %p69_p9, %p68_p7  ;;  %p2777_p13 = por %p75_p1, %p74_p10 }
  0x2a   : > { %3292 = sst [smem:[#allocation20_spill]] %s2769_s8  ;;  %p2781_p0 = por %p350_p11, %p68_p7 }
  0x2b   : > { %p356_p2 = scmp.eq.s32.totalorder %s2066_s24, 1  ;;  %p2236_p4 = scmp.lt.s32.totalorder %s2594_s16, 2 }
  0x2c   : > { %s466_s27 = sand.u32 1, %s2590_s15   ;;  %s2165_s2 = sshll.u32 %s2594_s16, 4 }
  0x2d   : > { %p2787_p6 = por %p356_p2, %p74_p10  ;;  %s2074_s22 = sshll.u32 %s466_s27, 4 }
  0x2e   : > { %s475_s28 = scalar_lea.hbm %s3261_s1, %s2165_s2  ;;  %s470_s0 = scalar_lea.vmem [#allocation6], %s2074_s22 }
  0x2f   : > { %s476_s19 = sshll.u32 %s475_s28, 4  ;;  %s478_s4 = sshll.u32 %s470_s0, 4  ;;  %s477_s19 = int_to_ptr.hbm [resolvable:$true] %s476_s19  ;;  %s479_s4 = int_to_ptr.vmem [resolvable:$true] %s478_s4 }
  0x30   : > { %p2797_p7 = pnand %p2236_p4, %p2771_p12  ;;  %s467_s10 = scalar_lea.sflag [#allocation3], %s466_s27 }
  0x31   : > { %s2486_s8 = sshra.s32 %s477_s19, 4  ;;  %s2493_s0 = scalar_lea.hbm %s3261_s1, 32  ;;  %s2487_s8 = int_to_ptr.hbm [resolvable:$true] %s2486_s8 }
  0x32   : > { %s2488_s15 = scalar_lea.hbm %s2487_s8, 16  ;;  %p2490_p9 = pneg %p2797_p7 }
  0x33   : > { %p2489_p8 = scmp.ne.s32.totalorder %s2487_s8, %s2488_s15  ;;  %p2494_p12 = scmp.lt.s32.totalorder %s2487_s8, %s3261_s1 }
  0x34   : > { %p2495_p2 = scmp.lt.s32.totalorder %s2493_s0, %s2488_s15 }
  0x35   : > { %p2491_p10 = pnand %p2490_p9, %p2489_p8 }
  0x36   : > { %p2496_p4 = por %p2495_p2, %p2494_p12 }
  0x37   : > { %p2492_p11 = pneg %p2491_p10 }
  0x39   : > { %p2497_p5 = pnand %p2496_p4, %p2492_p11 }
  0x3b   : > { %2500 = shalt.err (!%p2497_p5)
}
  0x3c   : > { %s2603_s27 = smov 128   ;;  %s2604_s18 = smov 8  }
  0x3d   : > { %2226 = dma.hbm_to_vmem [thread:$0]  (!%p2797_p7), %s477_s19, 256, %s479_s4, %s467_s10, %s2603_s27, %s2603_s27, %s2604_s18  }
  0x3e   : > { %490 = sbr.rel (%p2720_p3) target bundleno = 1875 (0x753), region = 76 }
  0x43   : > { %2561 = dma.done.wait (%p75_p1), [#allocation5], 16  }
  0x44   : > { %2563 = vsyncadd (%p75_p1), [#allocation5], 4294967280  ;;  %s2818_s15 = sand.u32 1, %s2586_s30  }
  0x45   : > { %s2079_s8 = sshll.u32 %s2818_s15, 4  ;;  %s498_s28 = scalar_lea.sflag [#allocation3], %s2818_s15 }
  0x46   : > { %s2824_s4 = scalar_lea.vmem [#allocation6], %s2079_s8 }
  0x47   : > { %2565 = dma.done.wait (%p2777_p13), %s498_s28, 256  }
  0x48   : > { %2567 = vsyncadd (%p2777_p13), %s498_s28, 4294967040 }
  0x49   : > { %2569 = dma.done.wait (%p75_p1), [#allocation8], 1024  }
  0x4a   : > { %2571 = vsyncadd (%p75_p1), [#allocation8], 4294966272 }
  0x4b   : > { %2573 = dma.done.wait (%p75_p1), [#allocation11], 1024  }
  0x4c   : > { %2575 = vsyncadd (%p75_p1), [#allocation11], 4294966272 }
  0x4d   : > { %527 = sfence }
  0x4e   : > { %v2839_v0 = vld [vmem:[%s2824_s4] sm:$0xff]  ;;  %vm573_vm0 = vcmask 523264   ;;  %v2844_v2 = vld [vmem:[%s2824_s4 + $0x8] sm:$0xff]  ;;  %v2605_v4 = vmov 64.0   ;;  %s2606_s11 = smov 96   ;;  %vm754_vm8 = vcmask 1047556  }
  0x4f   : > { %v574_v1 = vsel %vm573_vm0, %v2839_v0, 0.0  ;;  %v577_v3 = vsel %vm573_vm0, %v2844_v2, 0.0  ;;  %2323 = vrcp.f32 %v2605_v4  ;;  %v2173_v7 = vld [vmem:[#allocation9 + $0x18] sm:$0xff]  ;;  %v2172_v9 = vld [vmem:[#allocation9 + $0x10] sm:$0xff]  ;;  %v2171_v11 = vld [vmem:[#allocation9 + $0x8] sm:$0xff]  ;;  %v691_v14 = vpack.c.bf16 %v2844_v2, %v2839_v0  ;;  %s2611_s23 = smov 64  }
  0x50   : > { %575 = vadd.xlane.f32.xlu0 %v574_v1  ;;  %735 = vmatpush.bf16.msra.mxu1 %v2173_v7  ;;  %v2170_v13 = vld [vmem:[#allocation9] sm:$0xff]  ;;  %v2169_v26 = vld [vmem:[#allocation7 + $0x18] sm:$0xff]  ;;  %v2168_v27 = vld [vmem:[#allocation7 + $0x10] sm:$0xff]  ;;  %v1327_v4 = vand.u32 2147483647, %v2844_v2  ;;  %vm1397_vm9 = vcmask 261120  }
  0x51   : > { %679 = vmatpush.bf16.msra.mxu0 %v2169_v26  ;;  %v2167_v28 = vld [vmem:[#allocation7 + $0x8] sm:$0xff]  ;;  %v2166_v30 = vld [vmem:[#allocation7] sm:$0xff]  ;;  %v2607_v7 = vmov 1983009808   ;;  %vm1448_vm14 = vcmask 130048   ;;  %s2613_s27 = smov 32  }
  0x52   : > { %v2317_v36 = vld [vmem:[%s3265_s5] ss:$0 sm:$0xff]  ;;  %s1747_s18 = sld [smem:[#allocation2]]  ;;  %s2182_s26 = sshll.u32 %s2715_s20, 4 }
  0x53   : > { %v2315_v55 = vld [vmem:[%s3266_s6] ss:$0 sm:$0xff]  ;;  %s2159_s24 = sld [smem:[#allocation2 + $0x1]]  ;;  %s1928_s20 = scalar_lea.sflag [#allocation4], %s2818_s15 }
  0x54   : > { %736 = vmatpush.bf16.msra.mxu1 %v2172_v9  ;;  %v2316_v60 = vld [vmem:[%s3267_s7] ss:$0 sm:$0xff]  ;;  %s3298_s0 = sld [smem:[#allocation26_spill]] }
  0x55   : > { %v2324_v5 = vpop.eup %2323  ;;  %680 = vmatpush.bf16.msra.mxu0 %v2168_v27 }
  0x56   : > { %v581_v6 = vmul.f32 64.0, %v2324_v5  ;;  %vm585_vm1 = vweird.f32 %v2324_v5 }
  0x58   : > { %578 = vadd.xlane.f32.xlu0 %v577_v3  ;;  %v582_v8 = vsub.f32 1.0, %v581_v6  ;;  %737 = vmatpush.bf16.msra.mxu1 %v2171_v11  ;;  %v1326_v3 = vand.u32 2147483647, %v2839_v0  ;;  %v1331_v6 = vsel %vm573_vm0, %v1327_v4, 0.0 }
  0x59   : > { %681 = vmatpush.bf16.msra.mxu0 %v2167_v28 }
  0x5a   : > { %v583_v10 = vmul.f32 %v2324_v5, %v582_v8  ;;  %v757_v8 = vunpack.c.l.s4 %v2607_v7 }
  0x5c   : > { %v584_v12 = vadd.f32 %v2324_v5, %v583_v10  ;;  %738 = vmatpush.bf16.msra.mxu1 %v2170_v13  ;;  %v2879_v10 = vunpack.c.0.s8 %v757_v8 }
  0x5d   : > { %682 = vmatpush.bf16.msra.mxu0 %v2166_v30 }
  0x5e   : > { %v2850_v15 = vsel %vm585_vm1, %v2324_v5, %v584_v12  ;;  %v1328_v5 = vsel %vm573_vm0, %v1326_v3, 0.0 }
  0x5f   : > { %2118 = vmatmul.msk.bf16.vlgmr.msra.gmra.mxu1 %vm573_vm0, %v691_v14  ;;  %v2608_v14 = vmov 1934713408  }
  0x60   : > { %1329 = vadd.xlane.f32.xlu0 %v1328_v5 }
  0xc3   : > { %v576_v16 = vpop.xlane.xlu0 %575 }
  0xc4   : > { %v587_v17 = vmul.f32 %v2850_v15, %v576_v16  ;;  %v779_v16 = vunpack.c.l.s4 %v2608_v14 }
  0xc6   : > { %v589_v18 = vsub.f32 %v2839_v0, %v587_v17 }
  0xc8   : > { %v591_v19 = vmul.f32 %v589_v18, %v589_v18 }
  0xca   : > { %v593_v20 = vsel %vm573_vm0, %v591_v19, 0.0 }
  0xcb   : > { %594 = vadd.xlane.f32.xlu1 %v593_v20  ;;  %v579_v21 = vpop.xlane.xlu0 %578 }
  0xcc   : > { %v588_v22 = vmul.f32 %v2850_v15, %v579_v21 }
  0xce   : > { %v590_v23 = vsub.f32 %v2844_v2, %v588_v22 }
  0xd0   : > { %v592_v24 = vmul.f32 %v590_v23, %v590_v23 }
  0xd2   : > { %v596_v25 = vsel %vm573_vm0, %v592_v24, 0.0 }
  0xd3   : > { %597 = vadd.xlane.f32.xlu1 %v596_v25 }
  0xdb   : > { %1332 = vadd.xlane.f32.xlu1 %v1331_v6 }
  0xdc   : > { %v740_v33 = vpop.f32.mrf.mxu1 }
  0xdd   : > { %v741_v41 = vadd.f32 %v2317_v36, %v740_v33 }
  0xdf   : > { %v946_v11 = vrot.slane %v741_v41, 4  ;;  %v951_v0 = vperm.slane %v741_v41, %v2879_v10 }
  0xe1   : > { %v968_v22 = vrot.slane %v951_v0, 4 }
  0xe4   : > { %v742_v42 = vpop.f32.mrf.mxu1 }
  0xe5   : > { %v743_v44 = vadd.f32 %v2317_v36, %v742_v42 }
  0xe7   : > { %v2864_v46 = vpack.i.bf16 %v743_v44, %v741_v41  ;;  %v998_v9 = vrot.slane %v743_v44, 4  ;;  %v1003_v13 = vperm.slane %v743_v44, %v2879_v10 }
  0xe9   : > { %2296 = vrot.lane.b32.xlu2 %v2864_v46, %s2606_s11  ;;  %v999_v12 = vsel %vm754_vm8, 0.0, %v998_v9  ;;  %v1020_v19 = vrot.slane %v1003_v13, 4 }
  0xea   : > { %v1007_v2 = vperm.slane %v999_v12, %v2879_v10 }
  0xec   : > { %v1032_v28 = vrot.slane %v1007_v2, 4 }
 0x13e   : > { %v595_v29 = vpop.xlane.xlu1 %594 }
 0x13f   : > { %v599_v31 = vmul.f32 %v595_v29, %v2850_v15  ;;  %v2893_v29 = vunpack.c.0.s8 %v779_v16 }
 0x141   : > { %v601_v32 = vadd.f32 1e-08, %v599_v31 }
 0x143   : > { %2325 = vrsqrt.f32 %v601_v32  ;;  %vm609_vm3 = vweird.f32 %v601_v32  ;;  %v2885_v17 = vpop.permute.xlu2 %2296 }
 0x144   : > { %v2299_v20 = vunpack.i.h.bf16 %v2885_v17  ;;  %v2298_v21 = vunpack.i.l.bf16 %v2885_v17 }
 0x146   : > { %v598_v34 = vpop.xlane.xlu1 %597  ;;  %v1013_v24 = vperm.slane %v2299_v20, %v2879_v10  ;;  %v956_v25 = vrot.slane %v2298_v21, 4  ;;  %v961_v26 = vperm.slane %v2298_v21, %v2879_v10 }
 0x147   : > { %v600_v35 = vmul.f32 %v598_v34, %v2850_v15 }
 0x148   : > { %v1018_v31 = vrot.slane %v1013_v24, 4  ;;  %v957_v33 = vsel %vm754_vm8, 0.0, %v956_v25 }
 0x149   : > { %v2326_v37 = vpop.eup %2325  ;;  %v602_v38 = vadd.f32 1e-08, %v600_v35  ;;  %v965_v36 = vperm.slane %v957_v33, %v2879_v10 }
 0x14a   : > { %v604_v39 = vmul.f32 %v2326_v37, %v601_v32  ;;  %vm610_vm2 = vweird.f32 %v2326_v37  ;;  %v1021_v32 = vsel %vm754_vm8, %v1013_v24, %v1020_v19 }
 0x14b   : > { %2327 = vrsqrt.f32 %v602_v38  ;;  %vm611_vm4 = vmor %vm609_vm3, %vm610_vm2  ;;  %vm619_vm6 = vweird.f32 %v602_v38  ;;  %v1029_v35 = vperm.slane %v1021_v32, %v2893_v29 }
 0x14c   : > { %v605_v40 = vmul.f32 %v2326_v37, %v604_v39  ;;  %v969_v39 = vsel %vm754_vm8, %v961_v26, %v968_v22 }
 0x14e   : > { %v606_v43 = vmul.f32 0.5, %v605_v40 }
 0x150   : > { %v607_v45 = vsub.f32 1.5, %v606_v43 }
 0x151   : > { %v2328_v47 = vpop.eup %2327 }
 0x152   : > { %v608_v48 = vmul.f32 %v2326_v37, %v607_v45  ;;  %v614_v49 = vmul.f32 %v2328_v47, %v602_v38  ;;  %vm620_vm5 = vweird.f32 %v2328_v47  ;;  %v1019_v38 = vsel %vm754_vm8, %v1018_v31, %v1003_v13 }
 0x153   : > { %vm621_vm7 = vmor %vm619_vm6, %vm620_vm5  ;;  %v977_v45 = vperm.slane %v969_v39, %v2893_v29 }
 0x154   : > { %v615_v50 = vmul.f32 %v2328_v47, %v614_v49  ;;  %v612_v51 = vsel %vm611_vm4, %v2326_v37, %v608_v48  ;;  %v966_v37 = vrot.slane %v961_v26, 4  ;;  %v1025_v48 = vperm.slane %v1019_v38, %v2893_v29 }
 0x155   : > { %v623_v54 = vmul.f32 %v612_v51, %v589_v18  ;;  %v947_v18 = vsel %vm754_vm8, 0.0, %v946_v11 }
 0x156   : > { %v616_v52 = vmul.f32 0.5, %v615_v50  ;;  %v955_v27 = vperm.slane %v947_v18, %v2879_v10  ;;  %v967_v44 = vsel %vm754_vm8, %v966_v37, %v951_v0  ;;  %v1044_v50 = vrot.slane %v1029_v35, 4 }
 0x157   : > { %v628_v59 = vmul.f32 %v2315_v55, %v623_v54  ;;  %v973_v51 = vperm.slane %v967_v44, %v2893_v29 }
 0x158   : > { %v617_v53 = vsub.f32 1.5, %v616_v52  ;;  %v980_v40 = vrot.slane %v955_v27, 4 }
 0x159   : > { %v633_v62 = vadd.f32 %v2316_v60, %v628_v59  ;;  %v992_v59 = vrot.slane %v977_v45, 4 }
 0x15a   : > { %v618_v56 = vmul.f32 %v2328_v47, %v617_v53 }
 0x15c   : > { %v622_v57 = vsel %vm621_vm7, %v2328_v47, %v618_v56  ;;  %v978_v47 = vrot.slane %v965_v36, 4 }
 0x15d   : > { %v624_v58 = vmul.f32 %v622_v57, %v590_v23  ;;  %v1008_v23 = vrot.slane %v2299_v20, 4 }
 0x15e   : > { %v979_v54 = vsel %vm754_vm8, %v978_v47, %v955_v27  ;;  %v1050_v27 = vsel %vm754_vm8, %v992_v59, %v973_v51 }
 0x15f   : > { %v629_v61 = vmul.f32 %v2315_v55, %v624_v58  ;;  %v1009_v30 = vsel %vm754_vm8, 0.0, %v1008_v23  ;;  %v981_v55 = vsel %vm754_vm8, %v965_v36, %v980_v40  ;;  %v985_v56 = vperm.slane %v979_v54, %v2893_v29 }
 0x160   : > { %v1017_v34 = vperm.slane %v1009_v30, %v2879_v10  ;;  %v989_v58 = vperm.slane %v981_v55, %v2893_v29  ;;  %v1054_v32 = vperm.slane %v1050_v27, %v2879_v10 }
 0x161   : > { %v634_v63 = vadd.f32 %v2316_v60, %v629_v61  ;;  %v1042_v60 = vrot.slane %v1025_v48, 4  ;;  %v1045_v61 = vsel %vm754_vm8, 0.0, %v1044_v50  ;;  %v994_v3 = vrot.slane %v985_v56, 4 }
 0x162   : > { %v1030_v41 = vrot.slane %v1017_v34, 4  ;;  %v1033_v42 = vsel %vm754_vm8, %v1017_v34, %v1032_v28  ;;  %v996_v4 = vrot.slane %v989_v58, 4  ;;  %v1093_v7 = vrot.slane %v1045_v61, 4 }
 0x163   : > { %v635_v1 = vpack.c.bf16 %v634_v63, %v633_v62  ;;  %v1041_v43 = vperm.slane %v1033_v42, %v2893_v29  ;;  %v990_v62 = vrot.slane %v973_v51, 4  ;;  %v1043_v11 = vsel %vm754_vm8, 0.0, %v1042_v60 }
 0x164   : > { %v1031_v49 = vsel %vm754_vm8, %v1030_v41, %v1007_v2  ;;  %v997_v6 = vsel %vm754_vm8, 0.0, %v996_v4  ;;  %v995_v13 = vsel %vm754_vm8, 0.0, %v994_v3  ;;  %v1061_v20 = vsel %vm754_vm8, %v996_v4, %v985_v56  ;;  %v2318_v4 = vld [vmem:[%s3263_s3] ss:$0 sm:$0xff] }
 0x165   : > { %2101 = vmatmul.msk.bf16.vlgmr.msra.gmra.mxu0 %vm573_vm0, %v635_v1  ;;  %v1037_v52 = vperm.slane %v1031_v49, %v2893_v29  ;;  %v1048_v53 = vrot.slane %v1041_v43, 4  ;;  %v993_v1 = vsel %vm754_vm8, 0.0, %v992_v59  ;;  %v1066_v9 = vrot.slane %v997_v6, 4 }
 0x166   : > { %v1055_v8 = vrot.slane %v993_v1, 4  ;;  %v991_v12 = vsel %vm754_vm8, 0.0, %v990_v62  ;;  %v1094_v21 = vsel %vm754_vm8, %v1093_v7, %v1043_v11  ;;  %v1065_v24 = vperm.slane %v1061_v20, %v2879_v10 }
 0x167   : > { %v1049_v57 = vsel %vm754_vm8, 0.0, %v1048_v53  ;;  %v1046_v63 = vrot.slane %v1037_v52, 4  ;;  %v1067_v2 = vsel %vm754_vm8, %v1066_v9, %v995_v13  ;;  %v1099_v22 = vsel %vm754_vm8, %v1048_v53, %v1037_v52  ;;  %v2960_v13 = vpop.xlane.xlu1 %1332 }
 0x168   : > { %v1104_v5 = vrot.slane %v1049_v57, 4  ;;  %v1071_v16 = vperm.slane %v1067_v2, %v2879_v10  ;;  %v1056_v19 = vsel %vm754_vm8, %v1055_v8, %v991_v12  ;;  %v1098_v26 = vperm.slane %v1094_v21, %v2879_v10  ;;  %v2957_v12 = vpop.xlane.xlu0 %1329 }
 0x169   : > { %v1047_v0 = vsel %vm754_vm8, 0.0, %v1046_v63  ;;  %v1060_v23 = vperm.slane %v1056_v19, %v2879_v10  ;;  %v1088_v28 = vsel %vm754_vm8, %v1044_v50, %v1025_v48  ;;  %v1103_v30 = vperm.slane %v1099_v22, %v2879_v10 }
 0x16a   : > { %v1105_v14 = vsel %vm754_vm8, %v1104_v5, %v1047_v0  ;;  %v1078_v25 = vrot.slane %v1071_v16, 4  ;;  %v1092_v35 = vperm.slane %v1088_v28, %v2879_v10  ;;  %v1110_v37 = vrot.slane %v1098_v26, 4 }
 0x16b   : > { %v1109_v18 = vperm.slane %v1105_v14, %v2879_v10  ;;  %v1072_v33 = vrot.slane %v1060_v23, 4  ;;  %vm1334_vm2 = vcmp.gt.f32.partialorder %v2957_v12, 0.0  ;;  %vm1335_vm3 = vcmp.gt.f32.partialorder %v2960_v13, 0.0 }
 0x16c   : > { %v1079_v34 = vsel %vm754_vm8, %v1078_v25, %v1065_v24  ;;  %v1111_v43 = vsel %vm754_vm8, %v1110_v37, %v1092_v35 }
 0x16d   : > { %v1116_v31 = vrot.slane %v1109_v18, 4  ;;  %v1083_v36 = vperm.slane %v1079_v34, %v2893_v29  ;;  %v1073_v39 = vsel %vm754_vm8, %v1072_v33, %v1054_v32  ;;  %v1115_v44 = vperm.slane %v1111_v43, %v2893_v29 }
 0x16e   : > { %v1077_v41 = vperm.slane %v1073_v39, %v2893_v29 }
 0x16f   : > { %v1117_v38 = vsel %vm754_vm8, %v1116_v31, %v1103_v30  ;;  %v1084_v42 = vrot.slane %v1083_v36, 4  ;;  %v1124_v51 = vrot.slane %v1115_v44, 4 }
 0x170   : > { %v1121_v40 = vperm.slane %v1117_v38, %v2893_v29  ;;  %v1086_v48 = vrot.slane %v1077_v41, 4 }
 0x171   : > { %v1085_v47 = vsel %vm754_vm8, %v1084_v42, %v1077_v41 }
 0x172   : > { %v1122_v45 = vrot.slane %v1121_v40, 4  ;;  %v1126_v50 = vpack.c.bf16 %v1085_v47, %v1085_v47  ;;  %v1087_v53 = vsel %vm754_vm8, %v1083_v36, %v1086_v48  ;;  %v1125_v55 = vsel %vm754_vm8, %v1121_v40, %v1124_v51 }
 0x173   : > { %v1128_v56 = vpack.c.bf16 %v1087_v53, %v1087_v53  ;;  %v1129_v58 = vpack.c.bf16 %v1125_v55, %v1125_v55 }
 0x174   : > { %v1123_v49 = vsel %vm754_vm8, %v1122_v45, %v1115_v44  ;;  %v1394_v54 = vunpack.c.l.b16 %v1126_v50 }
 0x175   : > { %v1127_v52 = vpack.c.bf16 %v1123_v49, %v1123_v49  ;;  %v1425_v59 = vunpack.c.l.b16 %v1128_v56  ;;  %v1426_v61 = vunpack.c.l.b16 %v1129_v58 }
 0x177   : > { %v1395_v57 = vunpack.c.l.b16 %v1127_v52  ;;  %v1427_v63 = vpack.c.b16 %v1426_v61, %v1425_v59 }
 0x179   : > { %v1396_v60 = vpack.c.b16 %v1395_v57, %v1394_v54  ;;  %v1432_v1 = vsel %vm1397_vm9, %v1427_v63, 0 }
 0x17a   : > { %1441 = vmatpush.bf16.xpose.msra.mxu3 %v1432_v1 }
 0x17b   : > { %v1402_v62 = vsel %vm1397_vm9, %v1396_v60, 0 }
 0x17c   : > { %1411 = vmatpush.bf16.xpose.msra.mxu2 %v1402_v62 }
 0x1e2   : > { %v684_v3 = vpop.f32.mrf.mxu0 }
 0x1e3   : > { %v685_v5 = vadd.f32 %v2318_v4, %v684_v3 }
 0x1e5   : > { %v689_v8 = vmul.f32 0.17677669, %v685_v5 }
 0x1e7   : > { %v753_v2 = vrot.slane %v689_v8, 4  ;;  %v759_v18 = vperm.slane %v689_v8, %v2879_v10 }
 0x1e9   : > { %v755_v21 = vsel %vm754_vm8, 0.0, %v753_v2  ;;  %v776_v31 = vrot.slane %v759_v18, 4 }
 0x1ea   : > { %v686_v6 = vpop.f32.mrf.mxu0  ;;  %v763_v30 = vperm.slane %v755_v21, %v2879_v10 }
 0x1eb   : > { %v687_v7 = vadd.f32 %v2318_v4, %v686_v6 }
 0x1ec   : > { %v788_v51 = vrot.slane %v763_v30, 4 }
 0x1ed   : > { %v690_v9 = vmul.f32 0.17677669, %v687_v7 }
 0x1ef   : > { %v2300_v11 = vpack.i.bf16 %v690_v9, %v689_v8  ;;  %v806_v0 = vrot.slane %v690_v9, 4  ;;  %v811_v16 = vperm.slane %v690_v9, %v2879_v10 }
 0x1f1   : > { %2301 = vrot.lane.b32.xlu2 %v2300_v11, %s2606_s11  ;;  %v807_v14 = vsel %vm754_vm8, 0.0, %v806_v0  ;;  %v828_v24 = vrot.slane %v811_v16, 4 }
 0x1f2   : > { %v815_v19 = vperm.slane %v807_v14, %v2879_v10 }
 0x1f4   : > { %v840_v32 = vrot.slane %v815_v19, 4 }
 0x217   : > { %1340 = vxpose.xlu2.b32.start [1/2] (short) (narrow) %v2957_v12, 8 }
 0x21f   : > { %1341 = vxpose.xlu2.b32.end [2/2] (short) (narrow) %v2960_v13, 8 }
 0x24b   : > { %v2302_v20 = vpop.permute.xlu2 %2301 }
 0x24c   : > { %v2304_v22 = vunpack.i.h.bf16 %v2302_v20  ;;  %v2303_v23 = vunpack.i.l.bf16 %v2302_v20 }
 0x24e   : > { %v816_v25 = vrot.slane %v2304_v22, 4  ;;  %v821_v26 = vperm.slane %v2304_v22, %v2879_v10  ;;  %v764_v27 = vrot.slane %v2303_v23, 4  ;;  %v769_v28 = vperm.slane %v2303_v23, %v2879_v10 }
 0x250   : > { %v817_v33 = vsel %vm754_vm8, 0.0, %v816_v25  ;;  %v826_v34 = vrot.slane %v821_v26, 4  ;;  %v829_v35 = vsel %vm754_vm8, %v821_v26, %v828_v24  ;;  %v765_v36 = vsel %vm754_vm8, 0.0, %v764_v27 }
 0x251   : > { %v825_v37 = vperm.slane %v817_v33, %v2879_v10  ;;  %v837_v38 = vperm.slane %v829_v35, %v2893_v29  ;;  %v773_v39 = vperm.slane %v765_v36, %v2879_v10  ;;  %v774_v40 = vrot.slane %v769_v28, 4 }
 0x252   : > { %v827_v41 = vsel %vm754_vm8, %v826_v34, %v811_v16  ;;  %v777_v42 = vsel %vm754_vm8, %v769_v28, %v776_v31 }
 0x253   : > { %v833_v43 = vperm.slane %v827_v41, %v2893_v29  ;;  %v838_v44 = vrot.slane %v825_v37, 4  ;;  %v841_v45 = vsel %vm754_vm8, %v825_v37, %v840_v32  ;;  %v852_v47 = vrot.slane %v837_v38, 4 }
 0x254   : > { %v849_v48 = vperm.slane %v841_v45, %v2893_v29  ;;  %v775_v49 = vsel %vm754_vm8, %v774_v40, %v759_v18  ;;  %v786_v50 = vrot.slane %v773_v39, 4  ;;  %v785_v58 = vperm.slane %v777_v42, %v2893_v29 }
 0x255   : > { %v839_v52 = vsel %vm754_vm8, %v838_v44, %v815_v19  ;;  %v850_v53 = vrot.slane %v833_v43, 4  ;;  %v853_v54 = vsel %vm754_vm8, 0.0, %v852_v47  ;;  %v781_v60 = vperm.slane %v775_v49, %v2893_v29 }
 0x256   : > { %v845_v55 = vperm.slane %v839_v52, %v2893_v29  ;;  %v856_v56 = vrot.slane %v849_v48, 4  ;;  %v901_v57 = vrot.slane %v853_v54, 4  ;;  %v787_v61 = vsel %vm754_vm8, %v786_v50, %v763_v30 }
 0x257   : > { %v851_v59 = vsel %vm754_vm8, 0.0, %v850_v53  ;;  %v789_v62 = vsel %vm754_vm8, %v773_v39, %v788_v51  ;;  %v896_v3 = vsel %vm754_vm8, %v852_v47, %v833_v43  ;;  %v793_v7 = vperm.slane %v787_v61, %v2893_v29 }
 0x258   : > { %v854_v63 = vrot.slane %v845_v55, 4  ;;  %v857_v1 = vsel %vm754_vm8, 0.0, %v856_v56  ;;  %v902_v4 = vsel %vm754_vm8, %v901_v57, %v851_v59  ;;  %v797_v8 = vperm.slane %v789_v62, %v2893_v29 }
 0x259   : > { %v906_v5 = vperm.slane %v902_v4, %v2879_v10  ;;  %v912_v6 = vrot.slane %v857_v1, 4  ;;  %v907_v11 = vsel %vm754_vm8, %v856_v56, %v845_v55  ;;  %v798_v0 = vrot.slane %v781_v60, 4 }
 0x25a   : > { %v855_v9 = vsel %vm754_vm8, 0.0, %v854_v63  ;;  %v800_v2 = vrot.slane %v785_v58, 4  ;;  %v802_v16 = vrot.slane %v793_v7, 4  ;;  %v804_v18 = vrot.slane %v797_v8, 4 }
 0x25b   : > { %v918_v14 = vrot.slane %v906_v5, 4  ;;  %v913_v19 = vsel %vm754_vm8, %v912_v6, %v855_v9  ;;  %v900_v20 = vperm.slane %v896_v3, %v2879_v10  ;;  %v799_v21 = vsel %vm754_vm8, 0.0, %v798_v0 }
 0x25c   : > { %v801_v22 = vsel %vm754_vm8, 0.0, %v800_v2  ;;  %v917_v23 = vperm.slane %v913_v19, %v2879_v10  ;;  %v803_v24 = vsel %vm754_vm8, 0.0, %v802_v16  ;;  %v805_v25 = vsel %vm754_vm8, 0.0, %v804_v18 }
 0x25d   : > { %v863_v26 = vrot.slane %v801_v22, 4  ;;  %v874_v27 = vrot.slane %v805_v25, 4  ;;  %v911_v28 = vperm.slane %v907_v11, %v2879_v10  ;;  %v919_v30 = vsel %vm754_vm8, %v918_v14, %v900_v20 }
 0x25e   : > { %v924_v31 = vrot.slane %v917_v23, 4  ;;  %v858_v32 = vsel %vm754_vm8, %v800_v2, %v781_v60  ;;  %v923_v34 = vperm.slane %v919_v30, %v2893_v29  ;;  %v869_v36 = vsel %vm754_vm8, %v804_v18, %v793_v7 }
 0x25f   : > { %v864_v33 = vsel %vm754_vm8, %v863_v26, %v799_v21  ;;  %v875_v37 = vsel %vm754_vm8, %v874_v27, %v803_v24  ;;  %v862_v42 = vperm.slane %v858_v32, %v2879_v10  ;;  %v873_v44 = vperm.slane %v869_v36, %v2879_v10 }
 0x260   : > { %v868_v35 = vperm.slane %v864_v33, %v2879_v10  ;;  %v925_v38 = vsel %vm754_vm8, %v924_v31, %v911_v28  ;;  %v879_v39 = vperm.slane %v875_v37, %v2879_v10  ;;  %v932_v41 = vrot.slane %v923_v34, 4 }
 0x261   : > { %v929_v40 = vperm.slane %v925_v38, %v2893_v29  ;;  %v1373_v7 = vlaneseq  ;;  %v2609_v8 = vmov 0   ;;  %v2610_v14 = vmov -4.2949673e+09  }
 0x262   : > { %v880_v43 = vrot.slane %v868_v35, 4  ;;  %v886_v45 = vrot.slane %v879_v39, 4 }
 0x263   : > { %v933_v47 = vsel %vm754_vm8, %v929_v40, %v932_v41  ;;  %v930_v48 = vrot.slane %v929_v40, 4  ;;  %v1374_v0 = vshrl.u32 %v1373_v7, 7  ;;  %v1377_v2 = vand.u32 127, %v1373_v7 }
 0x264   : > { %v881_v49 = vsel %vm754_vm8, %v880_v43, %v862_v42  ;;  %v887_v51 = vsel %vm754_vm8, %v886_v45, %v873_v44  ;;  %v937_v54 = vpack.c.bf16 %v933_v47, %v933_v47 }
 0x265   : > { %v885_v50 = vperm.slane %v881_v49, %v2893_v29  ;;  %v931_v52 = vsel %vm754_vm8, %v930_v48, %v923_v34  ;;  %v891_v53 = vperm.slane %v887_v51, %v2893_v29  ;;  %vm1378_vm12 = vcmp.le.s32.totalorder %v1377_v2, %v1374_v0 }
 0x266   : > { %v935_v56 = vpack.c.bf16 %v931_v52, %v931_v52  ;;  %v1421_v60 = vunpack.c.l.b16 %v937_v54  ;;  %v1375_v18 = vadd.s32 8, %v1374_v0 }
 0x267   : > { %v894_v55 = vrot.slane %v885_v50, 4  ;;  %v892_v57 = vrot.slane %v891_v53, 4 }
 0x268   : > { %v1390_v63 = vunpack.c.l.b16 %v935_v56  ;;  %vm1379_vm15 = vcmp.le.s32.totalorder %v1377_v2, %v1375_v18 }
 0x269   : > { %v895_v58 = vsel %vm754_vm8, %v891_v53, %v894_v55  ;;  %v893_v61 = vsel %vm754_vm8, %v892_v57, %v885_v50 }
 0x26a   : > { %v936_v59 = vpack.c.bf16 %v895_v58, %v895_v58  ;;  %v934_v62 = vpack.c.bf16 %v893_v61, %v893_v61 }
 0x26c   : > { %v1420_v1 = vunpack.c.l.b16 %v936_v59  ;;  %v1389_v3 = vunpack.c.l.b16 %v934_v62 }
 0x26e   : > { %v1422_v4 = vpack.c.b16 %v1421_v60, %v1420_v1  ;;  %v1391_v5 = vpack.c.b16 %v1390_v63, %v1389_v3 }
 0x270   : > { %2122 = vmatmul.msk.bf16.vlgmr.msra.gmra.mxu3 %vm1397_vm9, %v1422_v4  ;;  %2121 = vmatmul.msk.bf16.vlgmr.msra.gmra.mxu2 %vm1397_vm9, %v1391_v5 }
 0x2b0   : > { %v1356_v6 = vpop.trf.xlu2 }
 0x2b1   : > { %vm1372_vm10 = vcmp.gt.f32.partialorder %v1356_v6, 0.0 }
 0x2b2   : > { %v1380_v9 = vsel %vm1372_vm10, 1, %v2609_v8 }
 0x2b3   : > { %v1381_v11 = vperm.slane %v1380_v9, 0 }
 0x2b5   : > { %vm1382_vm11 = vcmp.eq.s32.totalorder %v1381_v11, 1 }
 0x2b6   : > { %vm1383_vm13 = vmand %vm1378_vm12, %vm1382_vm11 }
 0x2b7   : > { %v1385_v16 = vsel %vm1383_vm13, 0.0, %v2610_v14  ;;  %vm1384_vm1 = vmand %vm1379_vm15, %vm1382_vm11 }
 0x2b8   : > { %v1386_v24 = vsel %vm1384_vm1, 0.0, %v2610_v14 }
 0x2f3   : > { %v1443_v19 = vpop.f32.mrf.mxu3  ;;  %v1413_v21 = vpop.f32.mrf.mxu2 }
 0x2f4   : > { %v1444_v20 = vadd.f32 %v1443_v19, %v1385_v16  ;;  %v1414_v23 = vadd.f32 %v1413_v21, %v1385_v16 }
 0x2f6   : > { %v1455_v22 = vsel %vm1448_vm14, %v1444_v20, -inf  ;;  %v1449_v28 = vsel %vm1448_vm14, %v1414_v23, -inf }
 0x2f7   : > { %1456 = vmax.xlane.f32.xlu0 %v1455_v22 }
 0x2fb   : > { %v1445_v25 = vpop.f32.mrf.mxu3  ;;  %v1415_v30 = vpop.f32.mrf.mxu2 }
 0x2fc   : > { %v1446_v26 = vadd.f32 %v1445_v25, %v1386_v24  ;;  %v1416_v31 = vadd.f32 %v1415_v30, %v1386_v24 }
 0x2fe   : > { %v1458_v27 = vsel %vm1448_vm14, %v1446_v26, -inf  ;;  %v1452_v32 = vsel %vm1448_vm14, %v1416_v31, -inf }
 0x2ff   : > { %1459 = vmax.xlane.f32.xlu1 %v1458_v27  ;;  %1450 = vmax.xlane.f32.xlu0 %v1449_v28 }
 0x307   : > { %1453 = vmax.xlane.f32.xlu1 %v1452_v32 }
 0x313   : > { %2306 = vrot.lane.b32.xlu0 %v2864_v46, %s2611_s23 }
 0x320   : > { %2311 = vrot.lane.b32.xlu1 %v2885_v17, %s2611_s23 }
 0x36a   : > { %v1457_v33 = vpop.xlane.xlu0 %1456 }
 0x36b   : > { %v1463_v34 = vsub.f32 %v1444_v20, %v1457_v33 }
 0x36d   : > { %v1469_v35 = vmul.f32 1.442695, %v1463_v34 }
 0x36f   : > { %2329 = vpow2.f32 %v1469_v35 }
 0x372   : > { %v1460_v36 = vpop.xlane.xlu1 %1459  ;;  %v1451_v37 = vpop.xlane.xlu0 %1450 }
 0x373   : > { %v1461_v38 = vsub.f32 %v1414_v23, %v1451_v37  ;;  %v1464_v41 = vsub.f32 %v1446_v26, %v1460_v36 }
 0x375   : > { %v3035_v39 = vpop.eup %2329  ;;  %v1465_v40 = vmul.f32 1.442695, %v1461_v38  ;;  %v1471_v43 = vmul.f32 1.442695, %v1464_v41 }
 0x376   : > { %v1479_v42 = vsel %vm1448_vm14, %v3035_v39, 0.0 }
 0x377   : > { %1480 = vadd.xlane.f32.xlu1 %v1479_v42  ;;  %2331 = vpow2.f32 %v1465_v40 }
 0x378   : > { %2333 = vpow2.f32 %v1471_v43 }
 0x37a   : > { %v1454_v46 = vpop.xlane.xlu1 %1453 }
 0x37b   : > { %v1462_v44 = vsub.f32 %v1416_v31, %v1454_v46 }
 0x37d   : > { %v1467_v17 = vmul.f32 1.442695, %v1462_v44  ;;  %v3039_v45 = vpop.eup %2331 }
 0x37e   : > { %v1473_v47 = vsel %vm1448_vm14, %v3039_v45, 0.0  ;;  %v3043_v48 = vpop.eup %2333 }
 0x37f   : > { %2335 = vpow2.f32 %v1467_v17  ;;  %1474 = vadd.xlane.f32.xlu0 %v1473_v47  ;;  %v1482_v54 = vsel %vm1448_vm14, %v3043_v48, 0.0 }
 0x385   : > { %v3045_v49 = vpop.eup %2335  ;;  %v2307_v50 = vpop.permute.xlu0 %2306 }
 0x386   : > { %v1476_v51 = vsel %vm1448_vm14, %v3045_v49, 0.0  ;;  %v2309_v52 = vunpack.i.h.bf16 %v2307_v50  ;;  %v2308_v53 = vunpack.i.l.bf16 %v2307_v50 }
 0x387   : > { %1477 = vadd.xlane.f32.xlu2 %v1476_v51  ;;  %1483 = vadd.xlane.f32.xlu0 %v1482_v54 }
 0x388   : > { %v1194_v55 = vrot.slane %v2309_v52, 4  ;;  %v1142_v56 = vrot.slane %v2308_v53, 4  ;;  %v1199_v59 = vperm.slane %v2309_v52, %v2879_v10  ;;  %v1147_v61 = vperm.slane %v2308_v53, %v2879_v10 }
 0x38a   : > { %v1195_v57 = vsel %vm754_vm8, 0.0, %v1194_v55  ;;  %v1143_v58 = vsel %vm754_vm8, 0.0, %v1142_v56  ;;  %v1216_v8 = vrot.slane %v1199_v59, 4  ;;  %v1164_v11 = vrot.slane %v1147_v61, 4 }
 0x38b   : > { %v1203_v60 = vperm.slane %v1195_v57, %v2879_v10  ;;  %v1151_v62 = vperm.slane %v1143_v58, %v2879_v10 }
 0x38d   : > { %v1228_v9 = vrot.slane %v1203_v60, 4  ;;  %v1176_v0 = vrot.slane %v1151_v62, 4 }
 0x392   : > { %v2312_v63 = vpop.permute.xlu1 %2311 }
 0x393   : > { %v2314_v1 = vunpack.i.h.bf16 %v2312_v63  ;;  %v2313_v3 = vunpack.i.l.bf16 %v2312_v63 }
 0x395   : > { %v1204_v4 = vrot.slane %v2314_v1, 4  ;;  %v1209_v5 = vperm.slane %v2314_v1, %v2879_v10  ;;  %v1152_v6 = vrot.slane %v2313_v3, 4  ;;  %v1157_v7 = vperm.slane %v2313_v3, %v2879_v10 }
 0x397   : > { %v1205_v2 = vsel %vm754_vm8, 0.0, %v1204_v4  ;;  %v1214_v14 = vrot.slane %v1209_v5, 4  ;;  %v1153_v16 = vsel %vm754_vm8, 0.0, %v1152_v6  ;;  %v1162_v18 = vrot.slane %v1157_v7, 4 }
 0x398   : > { %v1213_v19 = vperm.slane %v1205_v2, %v2879_v10  ;;  %v1161_v20 = vperm.slane %v1153_v16, %v2879_v10  ;;  %v1165_v21 = vsel %vm754_vm8, %v1157_v7, %v1164_v11  ;;  %v1217_v22 = vsel %vm754_vm8, %v1209_v5, %v1216_v8 }
 0x399   : > { %v1163_v23 = vsel %vm754_vm8, %v1162_v18, %v1147_v61  ;;  %v1173_v24 = vperm.slane %v1165_v21, %v2893_v29  ;;  %v1215_v25 = vsel %vm754_vm8, %v1214_v14, %v1199_v59  ;;  %v1225_v26 = vperm.slane %v1217_v22, %v2893_v29 }
 0x39a   : > { %v1226_v27 = vrot.slane %v1213_v19, 4  ;;  %v1169_v28 = vperm.slane %v1163_v23, %v2893_v29  ;;  %v1174_v30 = vrot.slane %v1161_v20, 4  ;;  %v1177_v31 = vsel %vm754_vm8, %v1161_v20, %v1176_v0 }
 0x39b   : > { %v1185_v32 = vperm.slane %v1177_v31, %v2893_v29  ;;  %v1188_v33 = vrot.slane %v1173_v24, 4  ;;  %v1221_v34 = vperm.slane %v1215_v25, %v2893_v29  ;;  %v1229_v35 = vsel %vm754_vm8, %v1213_v19, %v1228_v9 }
 0x39c   : > { %v1175_v36 = vsel %vm754_vm8, %v1174_v30, %v1151_v62  ;;  %v1186_v37 = vrot.slane %v1169_v28, 4  ;;  %v1227_v38 = vsel %vm754_vm8, %v1226_v27, %v1203_v60  ;;  %v1237_v40 = vperm.slane %v1229_v35, %v2893_v29 }
 0x39d   : > { %v1181_v41 = vperm.slane %v1175_v36, %v2893_v29  ;;  %v1192_v42 = vrot.slane %v1185_v32, 4  ;;  %v1233_v43 = vperm.slane %v1227_v38, %v2893_v29  ;;  %v1189_v46 = vsel %vm754_vm8, 0.0, %v1188_v33 }
 0x39e   : > { %v1238_v44 = vrot.slane %v1221_v34, 4  ;;  %v1240_v17 = vrot.slane %v1225_v26, 4  ;;  %v1244_v47 = vrot.slane %v1237_v40, 4  ;;  %v1187_v53 = vsel %vm754_vm8, 0.0, %v1186_v37 }
 0x39f   : > { %v1190_v50 = vrot.slane %v1181_v41, 4  ;;  %v1193_v51 = vsel %vm754_vm8, 0.0, %v1192_v42  ;;  %v1242_v52 = vrot.slane %v1233_v43, 4  ;;  %v1251_v57 = vrot.slane %v1189_v46, 4 }
 0x3a0   : > { %v1239_v54 = vsel %vm754_vm8, 0.0, %v1238_v44  ;;  %v1241_v55 = vsel %vm754_vm8, 0.0, %v1240_v17  ;;  %v1245_v56 = vsel %vm754_vm8, 0.0, %v1244_v47  ;;  %v1262_v58 = vrot.slane %v1193_v51, 4 }
 0x3a1   : > { %v1289_v59 = vrot.slane %v1241_v55, 4  ;;  %v1246_v60 = vsel %vm754_vm8, %v1188_v33, %v1169_v28  ;;  %v1300_v61 = vrot.slane %v1245_v56, 4  ;;  %v1191_v62 = vsel %vm754_vm8, 0.0, %v1190_v50 }
 0x3a2   : > { %v1243_v63 = vsel %vm754_vm8, 0.0, %v1242_v52  ;;  %v1252_v1 = vsel %vm754_vm8, %v1251_v57, %v1187_v53  ;;  %v1257_v4 = vsel %vm754_vm8, %v1192_v42, %v1181_v41  ;;  %v1263_v5 = vsel %vm754_vm8, %v1262_v58, %v1191_v62 }
 0x3a3   : > { %v1290_v3 = vsel %vm754_vm8, %v1289_v59, %v1239_v54  ;;  %v1284_v6 = vsel %vm754_vm8, %v1240_v17, %v1221_v34  ;;  %v1256_v7 = vperm.slane %v1252_v1, %v2879_v10  ;;  %v1267_v8 = vperm.slane %v1263_v5, %v2879_v10 }
 0x3a4   : > { %v1294_v9 = vperm.slane %v1290_v3, %v2879_v10  ;;  %v1250_v11 = vperm.slane %v1246_v60, %v2879_v10  ;;  %v1295_v0 = vsel %vm754_vm8, %v1244_v47, %v1233_v43  ;;  %v1301_v2 = vsel %vm754_vm8, %v1300_v61, %v1243_v63 }
 0x3a5   : > { %v1261_v14 = vperm.slane %v1257_v4, %v2879_v10  ;;  %v1268_v16 = vrot.slane %v1256_v7, 4  ;;  %v1274_v18 = vrot.slane %v1267_v8, 4  ;;  %v1305_v19 = vperm.slane %v1301_v2, %v2879_v10 }
 0x3a6   : > { %v1288_v20 = vperm.slane %v1284_v6, %v2879_v10  ;;  %v1306_v21 = vrot.slane %v1294_v9, 4  ;;  %v1299_v24 = vperm.slane %v1295_v0, %v2879_v10  ;;  %v2612_v62 = vmov 0.0  }
 0x3a7   : > { %v1269_v22 = vsel %vm754_vm8, %v1268_v16, %v1250_v11  ;;  %v1275_v23 = vsel %vm754_vm8, %v1274_v18, %v1261_v14  ;;  %v1312_v25 = vrot.slane %v1305_v19, 4  ;;  %v2119_v63 = vsel %vm1334_vm2, 1.0, %v2612_v62 }
 0x3a8   : > { %v1273_v26 = vperm.slane %v1269_v22, %v2893_v29  ;;  %v1279_v27 = vperm.slane %v1275_v23, %v2893_v29  ;;  %v1307_v28 = vsel %vm754_vm8, %v1306_v21, %v1288_v20  ;;  %v2120_v7 = vsel %vm1335_vm3, 1.0, %v2612_v62 }
 0x3a9   : > { %v1311_v30 = vperm.slane %v1307_v28, %v2893_v29  ;;  %v1313_v31 = vsel %vm754_vm8, %v1312_v25, %v1299_v24 }
 0x3aa   : > { %v1282_v32 = vrot.slane %v1273_v26, 4  ;;  %v1317_v33 = vperm.slane %v1313_v31, %v2893_v29  ;;  %v1280_v34 = vrot.slane %v1279_v27, 4 }
 0x3ab   : > { %v1320_v35 = vrot.slane %v1311_v30, 4 }
 0x3ac   : > { %v1283_v36 = vsel %vm754_vm8, %v1279_v27, %v1282_v32  ;;  %v1281_v37 = vsel %vm754_vm8, %v1280_v34, %v1273_v26  ;;  %v1318_v38 = vrot.slane %v1317_v33, 4 }
 0x3ad   : > { %v1321_v40 = vsel %vm754_vm8, %v1317_v33, %v1320_v35  ;;  %v1324_v41 = vpack.c.bf16 %v1283_v36, %v1283_v36  ;;  %v1322_v42 = vpack.c.bf16 %v1281_v37, %v1281_v37 }
 0x3ae   : > { %v1325_v43 = vpack.c.bf16 %v1321_v40, %v1321_v40  ;;  %v1319_v46 = vsel %vm754_vm8, %v1318_v38, %v1311_v30 }
 0x3af   : > { %v1536_v44 = vunpack.c.l.b16 %v1324_v41  ;;  %v1323_v17 = vpack.c.bf16 %v1319_v46, %v1319_v46  ;;  %v1508_v47 = vunpack.c.l.b16 %v1322_v42 }
 0x3b0   : > { %v1537_v50 = vunpack.c.l.b16 %v1325_v43 }
 0x3b1   : > { %v1509_v51 = vunpack.c.l.b16 %v1323_v17 }
 0x3b2   : > { %v1538_v52 = vpack.c.b16 %v1537_v50, %v1536_v44 }
 0x3b3   : > { %v1510_v53 = vpack.c.b16 %v1509_v51, %v1508_v47 }
 0x3b4   : > { %1550 = vmatpush.bf16.msrb.mxu3 %v1538_v52 }
 0x3b5   : > { %1522 = vmatpush.bf16.msrb.mxu2 %v1510_v53 }
 0x3ea   : > { %v1481_v54 = vpop.xlane.xlu1 %1480 }
 0x3eb   : > { %2337 = vrcp.f32 %v1481_v54 }
 0x3f1   : > { %v2338_v56 = vpop.eup %2337 }
 0x3f2   : > { %v1475_v55 = vpop.xlane.xlu0 %1474  ;;  %v1491_v61 = vmul.f32 %v2338_v56, %v3035_v39 }
 0x3f3   : > { %2339 = vrcp.f32 %v1475_v55 }
 0x3f4   : > { %v1495_v4 = vmul.f32 %v2119_v63, %v1491_v61 }
 0x3f9   : > { %v2340_v57 = vpop.eup %2339 }
 0x3fa   : > { %v1478_v58 = vpop.xlane.xlu2 %1477  ;;  %v1484_v59 = vpop.xlane.xlu0 %1483  ;;  %v1489_v60 = vmul.f32 %v2340_v57, %v3039_v45  ;;  %v1499_v45 = vpack.c.bf16 %v1495_v4, %v1495_v4 }
 0x3fb   : > { %2341 = vrcp.f32 %v1478_v58 }
 0x3fc   : > { %2343 = vrcp.f32 %v1484_v59  ;;  %v1493_v1 = vmul.f32 %v2119_v63, %v1489_v60  ;;  %v1531_v16 = vunpack.c.l.b16 %v1499_v45 }
 0x3fe   : > { %v1497_v12 = vpack.c.bf16 %v1493_v1, %v1493_v1 }
 0x400   : > { %v1503_v39 = vunpack.c.l.b16 %v1497_v12 }
 0x401   : > { %v2342_v3 = vpop.eup %2341 }
 0x402   : > { %v2344_v5 = vpop.eup %2343  ;;  %v1490_v6 = vmul.f32 %v2342_v3, %v3045_v49 }
 0x403   : > { %v1492_v8 = vmul.f32 %v2344_v5, %v3043_v48 }
 0x404   : > { %v1494_v9 = vmul.f32 %v2120_v7, %v1490_v6 }
 0x405   : > { %v1496_v11 = vmul.f32 %v2120_v7, %v1492_v8 }
 0x406   : > { %v1498_v0 = vpack.c.bf16 %v1494_v9, %v1494_v9 }
 0x407   : > { %v1500_v2 = vpack.c.bf16 %v1496_v11, %v1496_v11 }
 0x408   : > { %v1504_v14 = vunpack.c.l.b16 %v1498_v0 }
 0x409   : > { %v1532_v18 = vunpack.c.l.b16 %v1500_v2 }
 0x40a   : > { %v1505_v13 = vpack.c.b16 %v1504_v14, %v1503_v39 }
 0x40b   : > { %v1533_v19 = vpack.c.b16 %v1532_v18, %v1531_v16 }
 0x40c   : > { %2123 = vmatmul.msk.bf16.vlgmr.msrb.gmra.mxu2 %vm1448_vm14, %v1505_v13 }
 0x40d   : > { %2124 = vmatmul.msk.bf16.vlgmr.msrb.gmra.mxu3 %vm1448_vm14, %v1533_v19 }
 0x48f   : > { %v1524_v49 = vpop.f32.mrf.mxu2 }
 0x490   : > { %v1557_v20 = vrot.slane %v1524_v49, 4  ;;  %v1562_v48 = vperm.slane %v1524_v49, %v2879_v10  ;;  %v1552_v21 = vpop.f32.mrf.mxu3 }
 0x491   : > { %v1567_v22 = vrot.slane %v1552_v21, 4  ;;  %v1572_v23 = vperm.slane %v1552_v21, %v2879_v10 }
 0x492   : > { %v1558_v24 = vsel %vm754_vm8, 0.0, %v1557_v20  ;;  %v1579_v25 = vrot.slane %v1562_v48, 4 }
 0x493   : > { %v1566_v26 = vperm.slane %v1558_v24, %v2879_v10  ;;  %v1568_v27 = vsel %vm754_vm8, 0.0, %v1567_v22  ;;  %v1577_v28 = vrot.slane %v1572_v23, 4 }
 0x494   : > { %v1576_v30 = vperm.slane %v1568_v27, %v2879_v10  ;;  %v1580_v31 = vsel %vm754_vm8, %v1572_v23, %v1579_v25 }
 0x495   : > { %v1591_v32 = vrot.slane %v1566_v26, 4  ;;  %v1578_v33 = vsel %vm754_vm8, %v1577_v28, %v1562_v48  ;;  %v1588_v34 = vperm.slane %v1580_v31, %v2893_v29 }
 0x496   : > { %v1584_v35 = vperm.slane %v1578_v33, %v2893_v29  ;;  %v1589_v36 = vrot.slane %v1576_v30, 4 }
 0x497   : > { %v1592_v37 = vsel %vm754_vm8, %v1576_v30, %v1591_v32  ;;  %v1603_v38 = vrot.slane %v1588_v34, 4  ;;  %v1526_v40 = vpop.f32.mrf.mxu2 }
 0x498   : > { %v1590_v41 = vsel %vm754_vm8, %v1589_v36, %v1566_v26  ;;  %v1600_v42 = vperm.slane %v1592_v37, %v2893_v29  ;;  %v1601_v43 = vrot.slane %v1584_v35, 4  ;;  %v1609_v46 = vrot.slane %v1526_v40, 4  ;;  %v1554_v44 = vpop.f32.mrf.mxu3 }
 0x499   : > { %v1596_v17 = vperm.slane %v1590_v41, %v2893_v29  ;;  %v1604_v47 = vsel %vm754_vm8, 0.0, %v1603_v38  ;;  %v1614_v50 = vperm.slane %v1526_v40, %v2879_v10  ;;  %v1661_v53 = vsel %vm754_vm8, %v1603_v38, %v1584_v35 }
 0x49a   : > { %v1602_v51 = vsel %vm754_vm8, 0.0, %v1601_v43  ;;  %v1607_v52 = vrot.slane %v1600_v42, 4  ;;  %v1666_v54 = vrot.slane %v1604_v47, 4  ;;  %v1610_v56 = vsel %vm754_vm8, 0.0, %v1609_v46 }
 0x49b   : > { %v1605_v55 = vrot.slane %v1596_v17, 4  ;;  %v1631_v57 = vrot.slane %v1614_v50, 4  ;;  %v1619_v58 = vrot.slane %v1554_v44, 4  ;;  %v1618_v61 = vperm.slane %v1610_v56, %v2879_v10 }
 0x49c   : > { %v1608_v59 = vsel %vm754_vm8, 0.0, %v1607_v52  ;;  %v1667_v60 = vsel %vm754_vm8, %v1666_v54, %v1602_v51  ;;  %v1624_v62 = vperm.slane %v1554_v44, %v2879_v10  ;;  %v1665_v9 = vperm.slane %v1661_v53, %v2879_v10 }
 0x49d   : > { %v1677_v63 = vrot.slane %v1608_v59, 4  ;;  %v1620_v1 = vsel %vm754_vm8, 0.0, %v1619_v58  ;;  %v1606_v3 = vsel %vm754_vm8, 0.0, %v1605_v55  ;;  %v1671_v4 = vperm.slane %v1667_v60, %v2879_v10 }
 0x49e   : > { %v1643_v5 = vrot.slane %v1618_v61, 4  ;;  %v1628_v6 = vperm.slane %v1620_v1, %v2879_v10  ;;  %v1629_v7 = vrot.slane %v1624_v62, 4  ;;  %v1632_v8 = vsel %vm754_vm8, %v1624_v62, %v1631_v57  ;;  %v2349_v1 = vld [vmem:[%s2824_s4] sm:$0xff] }
 0x49f   : > { %v1640_v12 = vperm.slane %v1632_v8, %v2893_v29  ;;  %v1678_v11 = vsel %vm754_vm8, %v1677_v63, %v1606_v3  ;;  %v1683_v45 = vrot.slane %v1671_v4, 4  ;;  %v1672_v14 = vsel %vm754_vm8, %v1607_v52, %v1596_v17 }
 0x4a0   : > { %v1630_v0 = vsel %vm754_vm8, %v1629_v7, %v1614_v50  ;;  %v1641_v2 = vrot.slane %v1628_v6, 4  ;;  %v1644_v39 = vsel %vm754_vm8, %v1628_v6, %v1643_v5  ;;  %v1682_v19 = vperm.slane %v1678_v11, %v2879_v10  ;;  %v2350_v7 = vld [vmem:[%s2824_s4 + $0x8] sm:$0xff]  ;;  %s567_s4 = scalar_lea.vmem [#allocation13], %s2079_s8 }
 0x4a1   : > { %v1636_v16 = vperm.slane %v1630_v0, %v2893_v29  ;;  %v1652_v18 = vperm.slane %v1644_v39, %v2893_v29  ;;  %v1655_v13 = vrot.slane %v1640_v12, 4  ;;  %v1684_v20 = vsel %vm754_vm8, %v1683_v45, %v1665_v9  ;;  %s1940_s10 = sshll.u32 %s567_s4, 4  ;;  %s1941_s10 = int_to_ptr.vmem [resolvable:$true] %s1940_s10 }
 0x4a2   : > { %v1642_v49 = vsel %vm754_vm8, %v1641_v2, %v1618_v61  ;;  %v1676_v25 = vperm.slane %v1672_v14, %v2879_v10  ;;  %v1688_v26 = vperm.slane %v1684_v20, %v2893_v29  ;;  %v1689_v27 = vrot.slane %v1682_v19, 4  ;;  %v2177_v19 = vld [vmem:[#allocation10 + $0x18] sm:$0xff] }
 0x4a3   : > { %v1648_v48 = vperm.slane %v1642_v49, %v2893_v29  ;;  %v1653_v21 = vrot.slane %v1636_v16, 4  ;;  %v1656_v22 = vsel %vm754_vm8, 0.0, %v1655_v13  ;;  %v1659_v23 = vrot.slane %v1652_v18, 4  ;;  %1853 = vmatpush.bf16.msrb.mxu0 %v2177_v19  ;;  %v2176_v49 = vld [vmem:[#allocation10 + $0x10] sm:$0xff] }
 0x4a4   : > { %v1704_v24 = vrot.slane %v1656_v22, 4  ;;  %v1699_v32 = vsel %vm754_vm8, %v1655_v13, %v1636_v16  ;;  %v1690_v35 = vsel %vm754_vm8, %v1689_v27, %v1676_v25  ;;  %v1697_v36 = vrot.slane %v1688_v26, 4 }
 0x4a5   : > { %v1654_v28 = vsel %vm754_vm8, 0.0, %v1653_v21  ;;  %v1657_v30 = vrot.slane %v1648_v48, 4  ;;  %v1660_v31 = vsel %vm754_vm8, 0.0, %v1659_v23  ;;  %v1694_v38 = vperm.slane %v1690_v35, %v2893_v29 }
 0x4a6   : > { %v1705_v33 = vsel %vm754_vm8, %v1704_v24, %v1654_v28  ;;  %v1715_v34 = vrot.slane %v1660_v31, 4  ;;  %v1703_v41 = vperm.slane %v1699_v32, %v2879_v10  ;;  %v1710_v42 = vsel %vm754_vm8, %v1659_v23, %v1648_v48  ;;  %v2175_v48 = vld [vmem:[#allocation10 + $0x8] sm:$0xff]  ;;  %v2174_v23 = vld [vmem:[#allocation10] sm:$0xff]  ;;  %v2181_v24 = vld [vmem:[#allocation12 + $0x18] sm:$0xff] }
 0x4a7   : > { %v1658_v37 = vsel %vm754_vm8, 0.0, %v1657_v30  ;;  %v1709_v40 = vperm.slane %v1705_v33, %v2879_v10  ;;  %v1698_v46 = vsel %vm754_vm8, %v1694_v38, %v1697_v36  ;;  %v1695_v44 = vrot.slane %v1694_v38, 4  ;;  %1854 = vmatpush.bf16.msrb.mxu0 %v2176_v49  ;;  %1909 = vmatpush.bf16.msrb.mxu1 %v2181_v24 }
 0x4a8   : > { %v1716_v43 = vsel %vm754_vm8, %v1715_v34, %v1658_v37  ;;  %1739 = vrot.lane.b32.xlu1 %v1698_v46, %s2613_s27  ;;  %v1714_v50 = vperm.slane %v1710_v42, %v2879_v10  ;;  %v1748_v60 = vstv %s1747_s18  ;;  %v2319_v42 = vld [vmem:[%s3272_s12] ss:$0 sm:$0xff]  ;;  %s3299_s18 = sld [smem:[#allocation27_spill]] }
 0x4a9   : > { %v1720_v17 = vperm.slane %v1716_v43, %v2879_v10  ;;  %v1721_v47 = vrot.slane %v1709_v40, 4  ;;  %v1696_v53 = vsel %vm754_vm8, %v1695_v44, %v1688_v26 }
 0x4ab   : > { %v1722_v51 = vsel %vm754_vm8, %v1721_v47, %v1703_v41  ;;  %v1727_v52 = vrot.slane %v1720_v17, 4  ;;  %1855 = vmatpush.bf16.msrb.mxu0 %v2175_v48  ;;  %v2320_v47 = vld [vmem:[%s3273_s13] ss:$0 sm:$0xff] }
 0x4ac   : > { %v1726_v54 = vperm.slane %v1722_v51, %v2893_v29 }
 0x4ad   : > { %v1728_v55 = vsel %vm754_vm8, %v1727_v52, %v1714_v50 }
 0x4ae   : > { %v1732_v56 = vperm.slane %v1728_v55, %v2893_v29  ;;  %v1735_v57 = vrot.slane %v1726_v54, 4  ;;  %v2179_v55 = vld [vmem:[#allocation12 + $0x8] sm:$0xff]  ;;  %s1939_s28 = scalar_lea.hbm %s3299_s18, %s2182_s26  ;;  %s2536_s2 = scalar_lea.hbm %s3299_s18, 32 }
 0x4af   : > { %1856 = vmatpush.bf16.msrb.mxu0 %v2174_v23  ;;  %s1942_s21 = sshll.u32 %s1939_s28, 4  ;;  %s1943_s21 = int_to_ptr.hbm [resolvable:$true] %s1942_s21 }
 0x4b0   : > { %v1736_v58 = vsel %vm754_vm8, %v1732_v56, %v1735_v57  ;;  %v1733_v59 = vrot.slane %v1732_v56, 4  ;;  %v2178_v56 = vld [vmem:[#allocation12] sm:$0xff]  ;;  %s2530_s11 = sshra.s32 %s1943_s21, 4  ;;  %s2531_s11 = int_to_ptr.hbm [resolvable:$true] %s2530_s11 }
 0x4b1   : > { %1741 = vrot.lane.b32.xlu0 %v1736_v58, %s2613_s27  ;;  %v2321_v58 = vld [vmem:[%s3269_s9] ss:$0 sm:$0xff]  ;;  %s2532_s19 = scalar_lea.hbm %s2531_s11, 16  ;;  %p2537_p13 = scmp.lt.s32.totalorder %s2531_s11, %s3299_s18 }
 0x4b2   : > { %v1734_v10 = vsel %vm754_vm8, %v1733_v59, %v1726_v54  ;;  %v2180_v54 = vld [vmem:[#allocation12 + $0x10] sm:$0xff]  ;;  %p2533_p1 = scmp.ne.s32.totalorder %s2531_s11, %s2532_s19  ;;  %p2538_p7 = scmp.lt.s32.totalorder %s2536_s2, %s2532_s19 }
 0x4b3   : > { %1910 = vmatpush.bf16.msrb.mxu1 %v2180_v54 }
 0x4b4   : > { %p2534_p3 = pnand %p2533_p1, %p2781_p0  ;;  %p2539_p8 = por %p2538_p7, %p2537_p13 }
 0x4b6   : > { %p2535_p5 = pneg %p2534_p3 }
 0x4b7   : > { %1911 = vmatpush.bf16.msrb.mxu1 %v2179_v55 }
 0x4b8   : > { %p2540_p9 = pnand %p2539_p8, %p2535_p5 }
 0x4bb   : > { %1912 = vmatpush.bf16.msrb.mxu1 %v2178_v56 }
 0x51a   : > { %v1740_v61 = vpop.permute.xlu1 %1739 }
 0x51b   : > { %v1745_v62 = vsel %vm1397_vm9, %v1696_v53, %v1740_v61 }
 0x51c   : > { %v1749_v63 = vmul.f32 %v1748_v60, %v1745_v62 }
 0x51e   : > { %v3189_v3 = vadd.f32 %v2349_v1, %v1749_v63  ;;  %v2322_v1 = vld [vmem:[%s3298_s0] ss:$0 sm:$0xff] }
 0x520   : > { %v1755_v29 = vsel %vm573_vm0, %v3189_v3, 0.0 }
 0x521   : > { %1756 = vadd.xlane.f32.xlu0 %v1755_v29 }
 0x523   : > { %v1742_v4 = vpop.permute.xlu0 %1741 }
 0x524   : > { %v1746_v5 = vsel %vm1397_vm9, %v1734_v10, %v1742_v4  ;;  %v1920_v4 = vstv %s2159_s24 }
 0x525   : > { %v1750_v6 = vmul.f32 %v1748_v60, %v1746_v5 }
 0x527   : > { %v3195_v8 = vadd.f32 %v2350_v7, %v1750_v6 }
 0x529   : > { %v1758_v9 = vsel %vm573_vm0, %v3195_v8, 0.0 }
 0x52a   : > { %1759 = vadd.xlane.f32.xlu1 %v1758_v9 }
 0x594   : > { %v1757_v12 = vpop.xlane.xlu0 %1756 }
 0x595   : > { %v1761_v11 = vmul.f32 %v1757_v12, %v2850_v15 }
 0x597   : > { %v1763_v45 = vsub.f32 %v3189_v3, %v1761_v11 }
 0x599   : > { %v1765_v0 = vmul.f32 %v1763_v45, %v1763_v45 }
 0x59b   : > { %v1767_v2 = vsel %vm573_vm0, %v1765_v0, 0.0 }
 0x59c   : > { %1768 = vadd.xlane.f32.xlu0 %v1767_v2 }
 0x59d   : > { %v1760_v39 = vpop.xlane.xlu1 %1759 }
 0x59e   : > { %v1762_v14 = vmul.f32 %v1760_v39, %v2850_v15 }
 0x5a0   : > { %v1764_v16 = vsub.f32 %v3195_v8, %v1762_v14 }
 0x5a2   : > { %v1766_v18 = vmul.f32 %v1764_v16, %v1764_v16 }
 0x5a4   : > { %v1770_v13 = vsel %vm573_vm0, %v1766_v18, 0.0 }
 0x5a5   : > { %1771 = vadd.xlane.f32.xlu1 %v1770_v13 }
 0x60f   : > { %v1769_v20 = vpop.xlane.xlu0 %1768 }
 0x610   : > { %v1773_v21 = vmul.f32 %v1769_v20, %v2850_v15 }
 0x612   : > { %v1775_v22 = vadd.f32 1e-08, %v1773_v21 }
 0x614   : > { %2345 = vrsqrt.f32 %v1775_v22  ;;  %vm1783_vm5 = vweird.f32 %v1775_v22 }
 0x618   : > { %v1772_v25 = vpop.xlane.xlu1 %1771 }
 0x619   : > { %v1774_v26 = vmul.f32 %v1772_v25, %v2850_v15 }
 0x61a   : > { %v2346_v28 = vpop.eup %2345 }
 0x61b   : > { %v1776_v27 = vadd.f32 1e-08, %v1774_v26  ;;  %v1778_v30 = vmul.f32 %v2346_v28, %v1775_v22  ;;  %vm1784_vm4 = vweird.f32 %v2346_v28 }
 0x61c   : > { %vm1785_vm6 = vmor %vm1783_vm5, %vm1784_vm4 }
 0x61d   : > { %2347 = vrsqrt.f32 %v1776_v27  ;;  %v1779_v31 = vmul.f32 %v2346_v28, %v1778_v30  ;;  %vm1793_vm8 = vweird.f32 %v1776_v27 }
 0x61f   : > { %v1780_v32 = vmul.f32 0.5, %v1779_v31 }
 0x621   : > { %v1781_v34 = vsub.f32 1.5, %v1780_v32 }
 0x623   : > { %v2348_v33 = vpop.eup %2347  ;;  %v1782_v36 = vmul.f32 %v2346_v28, %v1781_v34 }
 0x624   : > { %v1788_v35 = vmul.f32 %v2348_v33, %v1776_v27  ;;  %vm1794_vm7 = vweird.f32 %v2348_v33 }
 0x625   : > { %v1786_v38 = vsel %vm1785_vm6, %v2346_v28, %v1782_v36  ;;  %vm1795_vm9 = vmor %vm1793_vm8, %vm1794_vm7 }
 0x626   : > { %v1789_v37 = vmul.f32 %v2348_v33, %v1788_v35  ;;  %v1797_v15 = vmul.f32 %v1786_v38, %v1763_v45 }
 0x628   : > { %v1790_v40 = vmul.f32 0.5, %v1789_v37  ;;  %v1802_v17 = vmul.f32 %v2319_v42, %v1797_v15 }
 0x62a   : > { %v1791_v41 = vsub.f32 1.5, %v1790_v40  ;;  %v1807_v51 = vadd.f32 %v2320_v47, %v1802_v17 }
 0x62c   : > { %v1792_v43 = vmul.f32 %v2348_v33, %v1791_v41 }
 0x62e   : > { %v1796_v46 = vsel %vm1795_vm9, %v2348_v33, %v1792_v43 }
 0x62f   : > { %v1798_v44 = vmul.f32 %v1796_v46, %v1764_v16 }
 0x631   : > { %v1803_v50 = vmul.f32 %v2319_v42, %v1798_v44 }
 0x633   : > { %v1808_v52 = vadd.f32 %v2320_v47, %v1803_v50 }
 0x635   : > { %v1809_v53 = vpack.c.bf16 %v1808_v52, %v1807_v51 }
 0x637   : > { %2141 = vmatmul.msk.bf16.vlgmr.msrb.gmra.mxu0 %vm573_vm0, %v1809_v53 }
 0x6b4   : > { %v1858_v57 = vpop.f32.mrf.mxu0 }
 0x6b5   : > { %v1859_v59 = vadd.f32 %v2321_v58, %v1858_v57 }
 0x6b7   : > { %v1863_v61 = vmax.f32 %v1859_v59, 0.0 }
 0x6bc   : > { %v1860_v10 = vpop.f32.mrf.mxu0 }
 0x6bd   : > { %v1861_v60 = vadd.f32 %v2321_v58, %v1860_v10 }
 0x6bf   : > { %v1864_v62 = vmax.f32 %v1861_v60, 0.0 }
 0x6c1   : > { %v1865_v63 = vpack.c.bf16 %v1864_v62, %v1863_v61 }
 0x6c3   : > { %2158 = vmatmul.msk.bf16.vlgmr.msrb.gmra.mxu1 %vm573_vm0, %v1865_v63 }
 0x740   : > { %v1914_v29 = vpop.f32.mrf.mxu1 }
 0x741   : > { %v1915_v5 = vadd.f32 %v2322_v1, %v1914_v29 }
 0x743   : > { %v1921_v6 = vmul.f32 %v1920_v4, %v1915_v5 }
 0x745   : > { %v1923_v7 = vadd.f32 %v1921_v6, %v3189_v3 }
 0x747   : > { %1925 = vst.msk [vmem:[%s567_s4] sm:$0xff] %vm573_vm0, %v1923_v7 }
 0x748   : > { %v1916_v9 = vpop.f32.mrf.mxu1 }
 0x749   : > { %v1917_v12 = vadd.f32 %v2322_v1, %v1916_v9 }
 0x74b   : > { %v1922_v11 = vmul.f32 %v1920_v4, %v1917_v12 }
 0x74d   : > { %v1924_v45 = vadd.f32 %v1922_v11, %v3195_v8 }
 0x74f   : > { %1926 = vst.msk [vmem:[%s567_s4 + $0x8] sm:$0xff] %vm573_vm0, %v1924_v45 }
 0x750   : > { %2543 = shalt.err (!%p2540_p9)
}
 0x751   : > { %s2614_s15 = smov 128   ;;  %s2615_s26 = smov 8  }
 0x752   : > { %2205 = dma.vmem_to_hbm [thread:$0]  (%p2781_p0), %s1941_s10, 256, %s1943_s21, %s1928_s20, %s2614_s15, %s2614_s15, %s2615_s26  }
 0x753 PF: > { %s1957_s23 = sand.u32 1, %s2582_s29   ;;  %p3300_p10 = scmp.ge.s32.totalorder %s2594_s16, 2 }
 0x754   : > { %s1958_s27 = scalar_lea.sflag [#allocation4], %s1957_s23 }
 0x755   : > { %p2228_p11 = pnand %p3300_p10, %p2787_p6 }
 0x757   : > { %p2229_p12 = pneg %p2228_p11 }
 0x759   : > { %2577 = dma.done.wait (%p2229_p12), %s1958_s27, 256  }
 0x75a   : > { %2579 = vsyncadd (%p2229_p12), %s1958_s27, 4294967040  ;;  %s3301_s28 = sld [smem:[#allocation19_spill]]  ;;  %p30_p2 = scmp.ge.s32.totalorder %s2757_s25, 4  }
 0x75b   : > { %s3302_s15 = sld [smem:[#allocation20_spill]]  ;;  %s3303_s29 = smov %s2586_s30 }
 0x75c   : > { %s3305_s16 = smov %s2757_s25  ;;  %32 = sbr.rel (!%p30_p2) target bundleno = 16 (0x10), region = 142 }
 0x760   : > { %s3304_s30 = smov %s3301_s28 }
 0x761   :  { %1964 = vsyncpa [#allocation3], 1 }
 0x762   :  { %1966 = vsyncpa [#allocation3 + $0x1], 1 }
 0x763   :  { %1967 = vsyncpa [#allocation8], 1 }
 0x764   :  { %1968 = vsyncpa [#allocation11], 1 }
 0x765   :  { %1969 = vsyncpa [#allocation4], 1 }
 0x766   :  { %1971 = vsyncpa [#allocation4 + $0x1], 1 }
 0x767   :  { %1972 = vsyncpa [#allocation5], 1 }
 0x768   :  { %1974 = vsyncpa [#allocation5 + $0x1], 1 }

</bundles_post_ra>
